<compile_context>
chip_gen: v5e
topology: v5e:2x2
jax: 0.10.0
libtpu: 0.0.40
codegen_flags: <defaults>
</compile_context>

<pallas_src>
import functools

import jax
import jax.numpy as jnp
from jax.experimental import pallas as pl
from jax.experimental.pallas import tpu as pltpu


def _gru_seq_kernel(x_ref, mask_ref, h0_ref, wih_ref, whh_ref, bgx_ref, bhhn_ref,
                    out_ref, hN_ref,
                    h_scr, gxr_scr, gxz_scr, gxn_scr,
                    *, seq_len, guard_tail, unroll):
    """One grid step processes a chunk of Tc timesteps serially.

    x_ref:    (Tc, B, D)    streamed input chunk
    mask_ref: (T_pad, B, 1) episode-reset masks (resident, loaded once)
    h0_ref:   (B, H)        initial hidden state (resident)
    wih_ref:  (3, D, H)     input-to-hidden weights (resident)
    whh_ref:  (3, H, H)     hidden-to-hidden weights (resident)
    bgx_ref:  (3, 1, H)     folded biases: [b_ir+b_hr, b_iz+b_hz, b_in]
    bhhn_ref: (1, H)        b_hn (must stay inside r * (h @ W_hn + b_hn))
    out_ref:  (Tc, B, H)    per-step hidden outputs
    hN_ref:   (B, H)        final hidden state (resident across grid)
    h_scr:    (B, H) f32    carried hidden state scratch
    gx*_scr:  (Tc, B, H) f32 per-gate input pre-activations for this chunk
    """
    c = pl.program_id(0)
    Tc, B, D = x_ref.shape
    H = h_scr.shape[-1]

    @pl.when(c == 0)
    def _():
        h_scr[...] = h0_ref[...].astype(jnp.float32)

    # ---- Amortized per-chunk input projection: 3 lane-aligned MXU dots. ----
    # (The MXU is otherwise idle during the recurrence, so this is free compute
    #  and it kills the gx HBM round trip of the previous version.)
    x2d = x_ref[...].reshape(Tc * B, D).astype(jnp.float32)
    wih = wih_ref[...].astype(jnp.float32)          # (3, D, H)
    bgx = bgx_ref[...].astype(jnp.float32)          # (3, 1, H)
    gxr_scr[...] = (jnp.dot(x2d, wih[0], preferred_element_type=jnp.float32)
                    + bgx[0]).reshape(Tc, B, H)
    gxz_scr[...] = (jnp.dot(x2d, wih[1], preferred_element_type=jnp.float32)
                    + bgx[1]).reshape(Tc, B, H)
    gxn_scr[...] = (jnp.dot(x2d, wih[2], preferred_element_type=jnp.float32)
                    + bgx[2]).reshape(Tc, B, H)

    # ---- Hoisted hidden-to-hidden weights (resident; loaded once per chunk). ----
    whh = whh_ref[...].astype(jnp.float32)          # (3, H, H)
    whh_r, whh_z, whh_n = whh[0], whh[1], whh[2]
    bhh_n = bhhn_ref[...].astype(jnp.float32)       # (1, H)

    t0 = c * Tc

    def step(t, h):
        # Episode-reset masking of the carried hidden state: (B, H) * (B, 1).
        h_m = h * mask_ref[t0 + t].astype(jnp.float32)
        # Three separate per-gate dots keep every gate lane-aligned at offset 0
        # (the extra vmatmul pushes ride the vex slot and overlap).
        gh_r = jnp.dot(h_m, whh_r, preferred_element_type=jnp.float32)
        gh_z = jnp.dot(h_m, whh_z, preferred_element_type=jnp.float32)
        gh_n = jnp.dot(h_m, whh_n, preferred_element_type=jnp.float32) + bhh_n
        # PyTorch nn.GRU cell semantics (r, z, n gate order).
        r = jax.nn.sigmoid(gxr_scr[t] + gh_r)
        z = jax.nn.sigmoid(gxz_scr[t] + gh_z)
        n = jnp.tanh(gxn_scr[t] + r * gh_n)
        h_new = n + z * (h_m - n)           # == (1 - z) * n + z * h_m, one op fewer
        out_ref[t] = h_new.astype(out_ref.dtype)
        if guard_tail:
            # Padded tail timesteps must not advance the hidden state.
            h_new = jnp.where(t0 + t < seq_len, h_new, h)
        return h_new

    h_final = jax.lax.fori_loop(0, Tc, step, h_scr[...], unroll=unroll)
    h_scr[...] = h_final

    @pl.when(c == pl.num_programs(0) - 1)
    def _():
        hN_ref[...] = h_final.astype(hN_ref.dtype)


def _pick_time_chunk(T, B, D, H, dtype_bytes=4, vmem_budget_bytes=12 * 1024 * 1024):
    """Derive Tc from the VMEM budget (works for v7x's 64 MiB as well).

    Per-Tc bytes: double-buffered x (Tc,B,D) + out (Tc,B,H) streams plus the
    single-buffered f32 gate-preactivation scratch 3*(Tc,B,H).
    """
    per_tc = B * dtype_bytes * (2 * D + 2 * H) + B * 4 * 3 * H
    cap = max(1, vmem_budget_bytes // per_tc)
    cap = int(min(cap, T, 1024))            # keep trace / unrolled code size sane
    # Prefer the largest divisor of T within the cap (no tail padding) ...
    best_div = 1
    for cand in range(1, cap + 1):
        if T % cand == 0:
            best_div = cand
    # ... unless that divisor is much smaller than the cap (e.g. prime T), in
    # which case pad the tail rather than collapsing to tiny chunks.
    if 2 * best_div >= cap:
        return best_div
    return cap


def _vmem_limit_bytes(T_pad, Tc, B, D, H, dtype_bytes=4):
    streamed = 2 * Tc * B * (D + H) * dtype_bytes                   # x + out double-buffers
    scratch = (3 * Tc * B * H + B * H) * 4                          # gx scratch + h carry (f32)
    resident = (T_pad * B + 3 * D * H + 3 * H * H + 4 * H + 2 * B * H) * dtype_bytes
    need = streamed + scratch + 2 * resident + (2 << 20)            # headroom
    return int(min(max(need, 4 << 20), 48 << 20))                   # <= ~48 MiB (v7x-safe)


def gru_rnn_block(x, h0, masks, w_ih, w_hh, b_ih, b_hh):
    """x: (T,B,D), h0: (B,H), masks: (T,B,1), w_ih: (3,D,H), w_hh: (3,H,H),
    b_ih/b_hh: (3,1,H).  Returns (outputs (T,B,H), final_hidden (B,H))."""
    T, B, D = x.shape
    H = h0.shape[-1]
    if masks is None:
        masks = jnp.ones((T, B, 1), x.dtype)

    Tc = _pick_time_chunk(T, B, D, H)
    T_pad = ((T + Tc - 1) // Tc) * Tc
    guard_tail = T_pad != T
    if guard_tail:
        pad = T_pad - T
        x = jnp.pad(x, ((0, pad), (0, 0), (0, 0)))
        masks = jnp.pad(masks, ((0, pad), (0, 0), (0, 0)), constant_values=1.0)

    # Fold b_hh[r], b_hh[z] into the input-projection biases; only b_hh[n] stays
    # on the per-step dependency chain (inside r * (h @ W_hn + b_hn)).
    b_gx = jnp.stack([b_ih[0] + b_hh[0], b_ih[1] + b_hh[1], b_ih[2]], axis=0)  # (3,1,H)
    b_hh_n = b_hh[2]                                                            # (1,H)

    unroll = int(min(Tc, 8))        # partial unroll: LLO visibility w/o code bloat
    kernel = functools.partial(_gru_seq_kernel, seq_len=T,
                               guard_tail=guard_tail, unroll=unroll)

    out_shape = (
        jax.ShapeDtypeStruct((T_pad, B, H), x.dtype),   # per-step outputs
        jax.ShapeDtypeStruct((B, H), x.dtype),          # final hidden state
    )

    const2 = lambda c: (0, 0)
    const3 = lambda c: (0, 0, 0)
    grid_spec = pltpu.PrefetchScalarGridSpec(
        num_scalar_prefetch=0,
        grid=(T_pad // Tc,),
        in_specs=[
            pl.BlockSpec((Tc, B, D), lambda c: (c, 0, 0)),     # x chunk (streamed)
            pl.BlockSpec((T_pad, B, 1), const3),               # masks (resident)
            pl.BlockSpec((B, H), const2),                      # h0 (resident)
            pl.BlockSpec((3, D, H), const3),                   # W_ih (resident)
            pl.BlockSpec((3, H, H), const3),                   # W_hh (resident)
            pl.BlockSpec((3, 1, H), const3),                   # folded gx biases
            pl.BlockSpec((1, H), const2),                      # b_hh[n]
        ],
        out_specs=[
            pl.BlockSpec((Tc, B, H), lambda c: (c, 0, 0)),     # output chunk
            pl.BlockSpec((B, H), const2),                      # final hidden
        ],
        scratch_shapes=[
            pltpu.VMEM((B, H), jnp.float32),                   # hidden carry
            pltpu.VMEM((Tc, B, H), jnp.float32),               # gx_r chunk
            pltpu.VMEM((Tc, B, H), jnp.float32),               # gx_z chunk
            pltpu.VMEM((Tc, B, H), jnp.float32),               # gx_n chunk
        ],
    )

    # TODO(synk): on v7x (2 TCs) add a leading batch-parallel grid axis once
    # B >= 16 (dimension_semantics=("parallel","arbitrary")); at B=8 it only
    # adds per-step overhead.  bf16 storage of x/outputs/W_hh would halve HBM
    # traffic on v6e/v7x but breaks the 1e-4 f32 parity check used here.
    return pl.pallas_call(
        kernel,
        out_shape=out_shape,
        grid_spec=grid_spec,
        compiler_params=pltpu.CompilerParams(
            dimension_semantics=("arbitrary",),                # serial recurrence over time
            vmem_limit_bytes=_vmem_limit_bytes(T_pad, Tc, B, D, H),
        ),
    )(x, masks, h0, w_ih, w_hh, b_gx, b_hh_n)


def _postprocess(outs, T):
    return outs[:T]


def _reference(x, h0, masks, w_ih, w_hh, b_ih, b_hh):
    """Pure-JAX reference of the same GRU-with-masks forward."""
    def step(h, inp):
        x_t, m_t = inp
        h = h * m_t
        r = jax.nn.sigmoid(x_t @ w_ih[0] + b_ih[0] + h @ w_hh[0] + b_hh[0])
        z = jax.nn.sigmoid(x_t @ w_ih[1] + b_ih[1] + h @ w_hh[1] + b_hh[1])
        n = jnp.tanh(x_t @ w_ih[2] + b_ih[2] + r * (h @ w_hh[2] + b_hh[2]))
        h_new = (1.0 - z) * n + z * h
        return h_new, h_new
    h_final, outs = jax.lax.scan(step, h0, (x, masks))
    return outs, h_final


if __name__ == "__main__":
    # Small shapes consistent with the module: seq=8, batch=8,
    # input_dim=32, output_dim(hidden)=32.
    T, B, D, H = 8, 8, 32, 32
    key = jax.random.PRNGKey(0)
    kx, kh, k1, k2, k3, k4, km = jax.random.split(key, 7)

    # Deterministic "nn.GRU"-style init: uniform(-1/sqrt(H), 1/sqrt(H)).
    bound = 1.0 / jnp.sqrt(jnp.float32(H))
    w_ih = jax.random.uniform(k1, (3, D, H), jnp.float32, -bound, bound)
    w_hh = jax.random.uniform(k2, (3, H, H), jnp.float32, -bound, bound)
    b_ih = jax.random.uniform(k3, (3, 1, H), jnp.float32, -bound, bound)
    b_hh = jax.random.uniform(k4, (3, 1, H), jnp.float32, -bound, bound)

    x = jax.random.normal(kx, (T, B, D), jnp.float32)
    h0 = jax.random.normal(kh, (B, H), jnp.float32)
    # 0/1 episode-reset masks per (step, batch).
    masks = (jax.random.uniform(km, (T, B, 1)) > 0.2).astype(jnp.float32)

    gru_fn = jax.jit(gru_rnn_block)
    outs, h_final = gru_fn(x, h0, masks, w_ih, w_hh, b_ih, b_hh)
    outs = _postprocess(outs, T)
    jax.block_until_ready((outs, h_final))

    ref_outs, ref_h = _reference(x, h0, masks, w_ih, w_hh, b_ih, b_hh)
    assert jnp.allclose(outs, ref_outs, rtol=1e-4, atol=1e-4)
    assert jnp.allclose(h_final, ref_h, rtol=1e-4, atol=1e-4)

    print("KERNEL_OK")
</pallas_src>

<mosaic_0001>
module attributes {stable_mosaic.version = 11 : i64} {
  func.func @_gru_seq_kernel(%arg0: i32, %arg1: memref<8x8x32xf32, #tpu.memory_space<vmem>>, %arg2: memref<8x8x1xf32, #tpu.memory_space<vmem>>, %arg3: memref<8x32xf32, #tpu.memory_space<vmem>>, %arg4: memref<3x32x32xf32, #tpu.memory_space<vmem>>, %arg5: memref<3x32x32xf32, #tpu.memory_space<vmem>>, %arg6: memref<3x1x32xf32, #tpu.memory_space<vmem>>, %arg7: memref<1x32xf32, #tpu.memory_space<vmem>>, %arg8: memref<8x8x32xf32, #tpu.memory_space<vmem>>, %arg9: memref<8x32xf32, #tpu.memory_space<vmem>>, %arg10: memref<8x32xf32, #tpu.memory_space<vmem>>, %arg11: memref<8x8x32xf32, #tpu.memory_space<vmem>>, %arg12: memref<8x8x32xf32, #tpu.memory_space<vmem>>, %arg13: memref<8x8x32xf32, #tpu.memory_space<vmem>>) attributes {dimension_semantics = [#tpu.dimension_semantics<arbitrary>], iteration_bounds = array<i64: 1>, scalar_prefetch = 0 : i64, scratch_operands = 4 : i64, tpu.core_type = #tpu.core_type<tc>, window_params = [{transform_indices = @transform_0, window_bounds = array<i64: 8, 8, 32>}, {pipeline_mode = #tpu.pipeline_mode<synchronous>, transform_indices = @transform_1, window_bounds = array<i64: 8, 8, 1>}, {pipeline_mode = #tpu.pipeline_mode<synchronous>, transform_indices = @transform_2, window_bounds = array<i64: 8, 32>}, {pipeline_mode = #tpu.pipeline_mode<synchronous>, transform_indices = @transform_3, window_bounds = array<i64: 3, 32, 32>}, {pipeline_mode = #tpu.pipeline_mode<synchronous>, transform_indices = @transform_4, window_bounds = array<i64: 3, 32, 32>}, {pipeline_mode = #tpu.pipeline_mode<synchronous>, transform_indices = @transform_5, window_bounds = array<i64: 3, 1, 32>}, {pipeline_mode = #tpu.pipeline_mode<synchronous>, transform_indices = @transform_6, window_bounds = array<i64: 1, 32>}, {transform_indices = @transform_7, window_bounds = array<i64: 8, 8, 32>}, {pipeline_mode = #tpu.pipeline_mode<synchronous>, transform_indices = @transform_8, window_bounds = array<i64: 8, 32>}]} {
    %c0_i32 = arith.constant 0 : i32
    %0 = arith.cmpi eq, %arg0, %c0_i32 : i32
    %1 = arith.extui %0 : i1 to i32
    %c0_i32_0 = arith.constant 0 : i32
    %2 = arith.cmpi ne, %1, %c0_i32_0 : i32
    scf.if %2 {
      %c0_153 = arith.constant 0 : index
      %c0_154 = arith.constant 0 : index
      %384 = vector.load %arg3[%c0_153, %c0_154] : memref<8x32xf32, #tpu.memory_space<vmem>>, vector<8x32xf32>
      %c0_155 = arith.constant 0 : index
      %c0_156 = arith.constant 0 : index
      %385 = vector.load %arg10[%c0_155, %c0_156] : memref<8x32xf32, #tpu.memory_space<vmem>>, vector<8x32xf32>
      tpu.vector_store %arg10[%c0_155, %c0_156], %384 {strides = array<i32>} : memref<8x32xf32, #tpu.memory_space<vmem>>, vector<8x32xf32>,
    } else {
    }
    %c0 = arith.constant 0 : index
    %c0_1 = arith.constant 0 : index
    %c0_2 = arith.constant 0 : index
    %3 = vector.load %arg1[%c0, %c0_1, %c0_2] : memref<8x8x32xf32, #tpu.memory_space<vmem>>, vector<8x8x32xf32>
    %4 = vector.shape_cast %3 : vector<8x8x32xf32> to vector<64x32xf32>
    %c0_3 = arith.constant 0 : index
    %c0_4 = arith.constant 0 : index
    %c0_5 = arith.constant 0 : index
    %5 = vector.load %arg4[%c0_3, %c0_4, %c0_5] : memref<3x32x32xf32, #tpu.memory_space<vmem>>, vector<3x32x32xf32>
    %c0_6 = arith.constant 0 : index
    %c0_7 = arith.constant 0 : index
    %c0_8 = arith.constant 0 : index
    %6 = vector.load %arg6[%c0_6, %c0_7, %c0_8] : memref<3x1x32xf32, #tpu.memory_space<vmem>>, vector<3x1x32xf32>
    %7 = vector.extract_strided_slice %5 {offsets = [0, 0, 0], sizes = [1, 32, 32], strides = [1, 1, 1]} : vector<3x32x32xf32> to vector<1x32x32xf32>
    %8 = vector.shape_cast %7 : vector<1x32x32xf32> to vector<32x32xf32>
    %cst = arith.constant dense<0.000000e+00> : vector<64x32xf32>
    %9 = tpu.matmul %4, %8, %cst {dimension_numbers = #tpu.dot_dimension_numbers<[1], [0], [0], [1], [0, 0, 1, 1], [], []>} : vector<64x32xf32>, vector<32x32xf32>, vector<64x32xf32> -> vector<64x32xf32>
    %10 = vector.extract_strided_slice %6 {offsets = [0, 0, 0], sizes = [1, 1, 32], strides = [1, 1, 1]} : vector<3x1x32xf32> to vector<1x1x32xf32>
    %11 = vector.shape_cast %10 : vector<1x1x32xf32> to vector<1x32xf32>
    %12 = vector.broadcast %11 : vector<1x32xf32> to vector<64x32xf32>
    %13 = arith.addf %9, %12 : vector<64x32xf32>
    %14 = vector.shape_cast %13 : vector<64x32xf32> to vector<8x8x32xf32>
    %c0_9 = arith.constant 0 : index
    %c0_10 = arith.constant 0 : index
    %c0_11 = arith.constant 0 : index
    %15 = vector.load %arg11[%c0_9, %c0_10, %c0_11] : memref<8x8x32xf32, #tpu.memory_space<vmem>>, vector<8x8x32xf32>
    tpu.vector_store %arg11[%c0_9, %c0_10, %c0_11], %14 {strides = array<i32>} : memref<8x8x32xf32, #tpu.memory_space<vmem>>, vector<8x8x32xf32>,
    %16 = vector.extract_strided_slice %5 {offsets = [1, 0, 0], sizes = [1, 32, 32], strides = [1, 1, 1]} : vector<3x32x32xf32> to vector<1x32x32xf32>
    %17 = vector.shape_cast %16 : vector<1x32x32xf32> to vector<32x32xf32>
    %cst_12 = arith.constant dense<0.000000e+00> : vector<64x32xf32>
    %18 = tpu.matmul %4, %17, %cst_12 {dimension_numbers = #tpu.dot_dimension_numbers<[1], [0], [0], [1], [0, 0, 1, 1], [], []>} : vector<64x32xf32>, vector<32x32xf32>, vector<64x32xf32> -> vector<64x32xf32>
    %19 = vector.extract_strided_slice %6 {offsets = [1, 0, 0], sizes = [1, 1, 32], strides = [1, 1, 1]} : vector<3x1x32xf32> to vector<1x1x32xf32>
    %20 = vector.shape_cast %19 : vector<1x1x32xf32> to vector<1x32xf32>
    %21 = vector.broadcast %20 : vector<1x32xf32> to vector<64x32xf32>
    %22 = arith.addf %18, %21 : vector<64x32xf32>
    %23 = vector.shape_cast %22 : vector<64x32xf32> to vector<8x8x32xf32>
    %c0_13 = arith.constant 0 : index
    %c0_14 = arith.constant 0 : index
    %c0_15 = arith.constant 0 : index
    %24 = vector.load %arg12[%c0_13, %c0_14, %c0_15] : memref<8x8x32xf32, #tpu.memory_space<vmem>>, vector<8x8x32xf32>
    tpu.vector_store %arg12[%c0_13, %c0_14, %c0_15], %23 {strides = array<i32>} : memref<8x8x32xf32, #tpu.memory_space<vmem>>, vector<8x8x32xf32>,
    %25 = vector.extract_strided_slice %5 {offsets = [2, 0, 0], sizes = [1, 32, 32], strides = [1, 1, 1]} : vector<3x32x32xf32> to vector<1x32x32xf32>
    %26 = vector.shape_cast %25 : vector<1x32x32xf32> to vector<32x32xf32>
    %cst_16 = arith.constant dense<0.000000e+00> : vector<64x32xf32>
    %27 = tpu.matmul %4, %26, %cst_16 {dimension_numbers = #tpu.dot_dimension_numbers<[1], [0], [0], [1], [0, 0, 1, 1], [], []>} : vector<64x32xf32>, vector<32x32xf32>, vector<64x32xf32> -> vector<64x32xf32>
    %28 = vector.extract_strided_slice %6 {offsets = [2, 0, 0], sizes = [1, 1, 32], strides = [1, 1, 1]} : vector<3x1x32xf32> to vector<1x1x32xf32>
    %29 = vector.shape_cast %28 : vector<1x1x32xf32> to vector<1x32xf32>
    %30 = vector.broadcast %29 : vector<1x32xf32> to vector<64x32xf32>
    %31 = arith.addf %27, %30 : vector<64x32xf32>
    %32 = vector.shape_cast %31 : vector<64x32xf32> to vector<8x8x32xf32>
    %c0_17 = arith.constant 0 : index
    %c0_18 = arith.constant 0 : index
    %c0_19 = arith.constant 0 : index
    %33 = vector.load %arg13[%c0_17, %c0_18, %c0_19] : memref<8x8x32xf32, #tpu.memory_space<vmem>>, vector<8x8x32xf32>
    tpu.vector_store %arg13[%c0_17, %c0_18, %c0_19], %32 {strides = array<i32>} : memref<8x8x32xf32, #tpu.memory_space<vmem>>, vector<8x8x32xf32>,
    %c0_20 = arith.constant 0 : index
    %c0_21 = arith.constant 0 : index
    %c0_22 = arith.constant 0 : index
    %34 = vector.load %arg5[%c0_20, %c0_21, %c0_22] : memref<3x32x32xf32, #tpu.memory_space<vmem>>, vector<3x32x32xf32>
    %35 = vector.extract_strided_slice %34 {offsets = [0, 0, 0], sizes = [1, 32, 32], strides = [1, 1, 1]} : vector<3x32x32xf32> to vector<1x32x32xf32>
    %36 = vector.shape_cast %35 : vector<1x32x32xf32> to vector<32x32xf32>
    %37 = vector.extract_strided_slice %34 {offsets = [1, 0, 0], sizes = [1, 32, 32], strides = [1, 1, 1]} : vector<3x32x32xf32> to vector<1x32x32xf32>
    %38 = vector.shape_cast %37 : vector<1x32x32xf32> to vector<32x32xf32>
    %39 = vector.extract_strided_slice %34 {offsets = [2, 0, 0], sizes = [1, 32, 32], strides = [1, 1, 1]} : vector<3x32x32xf32> to vector<1x32x32xf32>
    %40 = vector.shape_cast %39 : vector<1x32x32xf32> to vector<32x32xf32>
    %c0_23 = arith.constant 0 : index
    %c0_24 = arith.constant 0 : index
    %41 = vector.load %arg7[%c0_23, %c0_24] : memref<1x32xf32, #tpu.memory_space<vmem>>, vector<1x32xf32>
    %c8_i32 = arith.constant 8 : i32
    %42 = arith.muli %arg0, %c8_i32 : i32
    %c0_25 = arith.constant 0 : index
    %c0_26 = arith.constant 0 : index
    %43 = vector.load %arg10[%c0_25, %c0_26] : memref<8x32xf32, #tpu.memory_space<vmem>>, vector<8x32xf32>
    %c0_i32_27 = arith.constant 0 : i32
    %44 = arith.addi %42, %c0_i32_27 : i32
    %45 = arith.index_cast %44 : i32 to index
    %c0_28 = arith.constant 0 : index
    %c0_29 = arith.constant 0 : index
    %46 = vector.load %arg2[%45, %c0_28, %c0_29] : memref<8x8x1xf32, #tpu.memory_space<vmem>>, vector<1x8x1xf32>
    %47 = vector.shape_cast %46 : vector<1x8x1xf32> to vector<8x1xf32>
    %48 = vector.broadcast %47 : vector<8x1xf32> to vector<8x32xf32>
    %49 = arith.mulf %43, %48 : vector<8x32xf32>
    %cst_30 = arith.constant dense<0.000000e+00> : vector<8x32xf32>
    %50 = tpu.matmul %49, %36, %cst_30 {dimension_numbers = #tpu.dot_dimension_numbers<[1], [0], [0], [1], [0, 0, 1, 1], [], []>} : vector<8x32xf32>, vector<32x32xf32>, vector<8x32xf32> -> vector<8x32xf32>
    %cst_31 = arith.constant dense<0.000000e+00> : vector<8x32xf32>
    %51 = tpu.matmul %49, %38, %cst_31 {dimension_numbers = #tpu.dot_dimension_numbers<[1], [0], [0], [1], [0, 0, 1, 1], [], []>} : vector<8x32xf32>, vector<32x32xf32>, vector<8x32xf32> -> vector<8x32xf32>
    %cst_32 = arith.constant dense<0.000000e+00> : vector<8x32xf32>
    %52 = tpu.matmul %49, %40, %cst_32 {dimension_numbers = #tpu.dot_dimension_numbers<[1], [0], [0], [1], [0, 0, 1, 1], [], []>} : vector<8x32xf32>, vector<32x32xf32>, vector<8x32xf32> -> vector<8x32xf32>
    %53 = vector.broadcast %41 : vector<1x32xf32> to vector<8x32xf32>
    %54 = arith.addf %52, %53 : vector<8x32xf32>
    %55 = arith.index_cast %c0_i32_27 : i32 to index
    %c0_33 = arith.constant 0 : index
    %c0_34 = arith.constant 0 : index
    %56 = vector.load %arg11[%55, %c0_33, %c0_34] : memref<8x8x32xf32, #tpu.memory_space<vmem>>, vector<1x8x32xf32>
    %57 = vector.shape_cast %56 : vector<1x8x32xf32> to vector<8x32xf32>
    %58 = arith.addf %57, %50 : vector<8x32xf32>
    %59 = arith.negf %58 : vector<8x32xf32>
    %60 = math.exp %59 : vector<8x32xf32>
    %cst_35 = arith.constant 1.000000e+00 : f32
    %61 = vector.broadcast %cst_35 : f32 to vector<8x32xf32>
    %62 = arith.addf %61, %60 : vector<8x32xf32>
    %63 = arith.divf %61, %62 : vector<8x32xf32>
    %64 = arith.index_cast %c0_i32_27 : i32 to index
    %c0_36 = arith.constant 0 : index
    %c0_37 = arith.constant 0 : index
    %65 = vector.load %arg12[%64, %c0_36, %c0_37] : memref<8x8x32xf32, #tpu.memory_space<vmem>>, vector<1x8x32xf32>
    %66 = vector.shape_cast %65 : vector<1x8x32xf32> to vector<8x32xf32>
    %67 = arith.addf %66, %51 : vector<8x32xf32>
    %68 = arith.negf %67 : vector<8x32xf32>
    %69 = math.exp %68 : vector<8x32xf32>
    %cst_38 = arith.constant 1.000000e+00 : f32
    %70 = vector.broadcast %cst_38 : f32 to vector<8x32xf32>
    %71 = arith.addf %70, %69 : vector<8x32xf32>
    %72 = arith.divf %70, %71 : vector<8x32xf32>
    %73 = arith.index_cast %c0_i32_27 : i32 to index
    %c0_39 = arith.constant 0 : index
    %c0_40 = arith.constant 0 : index
    %74 = vector.load %arg13[%73, %c0_39, %c0_40] : memref<8x8x32xf32, #tpu.memory_space<vmem>>, vector<1x8x32xf32>
    %75 = vector.shape_cast %74 : vector<1x8x32xf32> to vector<8x32xf32>
    %76 = arith.mulf %63, %54 : vector<8x32xf32>
    %77 = arith.addf %75, %76 : vector<8x32xf32>
    %78 = math.tanh %77 : vector<8x32xf32>
    %79 = arith.subf %49, %78 : vector<8x32xf32>
    %80 = arith.mulf %72, %79 : vector<8x32xf32>
    %81 = arith.addf %78, %80 : vector<8x32xf32>
    %82 = arith.index_cast %c0_i32_27 : i32 to index
    %c0_41 = arith.constant 0 : index
    %c0_42 = arith.constant 0 : index
    %83 = vector.load %arg8[%82, %c0_41, %c0_42] : memref<8x8x32xf32, #tpu.memory_space<vmem>>, vector<1x8x32xf32>
    %84 = vector.shape_cast %83 : vector<1x8x32xf32> to vector<8x32xf32>
    %85 = vector.shape_cast %81 : vector<8x32xf32> to vector<1x8x32xf32>
    tpu.vector_store %arg8[%82, %c0_41, %c0_42], %85 {strides = array<i32>} : memref<8x8x32xf32, #tpu.memory_space<vmem>>, vector<1x8x32xf32>,
    %c1_i32 = arith.constant 1 : i32
    %86 = arith.addi %42, %c1_i32 : i32
    %87 = arith.index_cast %86 : i32 to index
    %c0_43 = arith.constant 0 : index
    %c0_44 = arith.constant 0 : index
    %88 = vector.load %arg2[%87, %c0_43, %c0_44] : memref<8x8x1xf32, #tpu.memory_space<vmem>>, vector<1x8x1xf32>
    %89 = vector.shape_cast %88 : vector<1x8x1xf32> to vector<8x1xf32>
    %90 = vector.broadcast %89 : vector<8x1xf32> to vector<8x32xf32>
    %91 = arith.mulf %81, %90 : vector<8x32xf32>
    %cst_45 = arith.constant dense<0.000000e+00> : vector<8x32xf32>
    %92 = tpu.matmul %91, %36, %cst_45 {dimension_numbers = #tpu.dot_dimension_numbers<[1], [0], [0], [1], [0, 0, 1, 1], [], []>} : vector<8x32xf32>, vector<32x32xf32>, vector<8x32xf32> -> vector<8x32xf32>
    %cst_46 = arith.constant dense<0.000000e+00> : vector<8x32xf32>
    %93 = tpu.matmul %91, %38, %cst_46 {dimension_numbers = #tpu.dot_dimension_numbers<[1], [0], [0], [1], [0, 0, 1, 1], [], []>} : vector<8x32xf32>, vector<32x32xf32>, vector<8x32xf32> -> vector<8x32xf32>
    %cst_47 = arith.constant dense<0.000000e+00> : vector<8x32xf32>
    %94 = tpu.matmul %91, %40, %cst_47 {dimension_numbers = #tpu.dot_dimension_numbers<[1], [0], [0], [1], [0, 0, 1, 1], [], []>} : vector<8x32xf32>, vector<32x32xf32>, vector<8x32xf32> -> vector<8x32xf32>
    %95 = vector.broadcast %41 : vector<1x32xf32> to vector<8x32xf32>
    %96 = arith.addf %94, %95 : vector<8x32xf32>
    %97 = arith.index_cast %c1_i32 : i32 to index
    %c0_48 = arith.constant 0 : index
    %c0_49 = arith.constant 0 : index
    %98 = vector.load %arg11[%97, %c0_48, %c0_49] : memref<8x8x32xf32, #tpu.memory_space<vmem>>, vector<1x8x32xf32>
    %99 = vector.shape_cast %98 : vector<1x8x32xf32> to vector<8x32xf32>
    %100 = arith.addf %99, %92 : vector<8x32xf32>
    %101 = arith.negf %100 : vector<8x32xf32>
    %102 = math.exp %101 : vector<8x32xf32>
    %cst_50 = arith.constant 1.000000e+00 : f32
    %103 = vector.broadcast %cst_50 : f32 to vector<8x32xf32>
    %104 = arith.addf %103, %102 : vector<8x32xf32>
    %105 = arith.divf %103, %104 : vector<8x32xf32>
    %106 = arith.index_cast %c1_i32 : i32 to index
    %c0_51 = arith.constant 0 : index
    %c0_52 = arith.constant 0 : index
    %107 = vector.load %arg12[%106, %c0_51, %c0_52] : memref<8x8x32xf32, #tpu.memory_space<vmem>>, vector<1x8x32xf32>
    %108 = vector.shape_cast %107 : vector<1x8x32xf32> to vector<8x32xf32>
    %109 = arith.addf %108, %93 : vector<8x32xf32>
    %110 = arith.negf %109 : vector<8x32xf32>
    %111 = math.exp %110 : vector<8x32xf32>
    %cst_53 = arith.constant 1.000000e+00 : f32
    %112 = vector.broadcast %cst_53 : f32 to vector<8x32xf32>
    %113 = arith.addf %112, %111 : vector<8x32xf32>
    %114 = arith.divf %112, %113 : vector<8x32xf32>
    %115 = arith.index_cast %c1_i32 : i32 to index
    %c0_54 = arith.constant 0 : index
    %c0_55 = arith.constant 0 : index
    %116 = vector.load %arg13[%115, %c0_54, %c0_55] : memref<8x8x32xf32, #tpu.memory_space<vmem>>, vector<1x8x32xf32>
    %117 = vector.shape_cast %116 : vector<1x8x32xf32> to vector<8x32xf32>
    %118 = arith.mulf %105, %96 : vector<8x32xf32>
    %119 = arith.addf %117, %118 : vector<8x32xf32>
    %120 = math.tanh %119 : vector<8x32xf32>
    %121 = arith.subf %91, %120 : vector<8x32xf32>
    %122 = arith.mulf %114, %121 : vector<8x32xf32>
    %123 = arith.addf %120, %122 : vector<8x32xf32>
    %124 = arith.index_cast %c1_i32 : i32 to index
    %c0_56 = arith.constant 0 : index
    %c0_57 = arith.constant 0 : index
    %125 = vector.load %arg8[%124, %c0_56, %c0_57] : memref<8x8x32xf32, #tpu.memory_space<vmem>>, vector<1x8x32xf32>
    %126 = vector.shape_cast %125 : vector<1x8x32xf32> to vector<8x32xf32>
    %127 = vector.shape_cast %123 : vector<8x32xf32> to vector<1x8x32xf32>
    tpu.vector_store %arg8[%124, %c0_56, %c0_57], %127 {strides = array<i32>} : memref<8x8x32xf32, #tpu.memory_space<vmem>>, vector<1x8x32xf32>,
    %c2_i32 = arith.constant 2 : i32
    %128 = arith.addi %42, %c2_i32 : i32
    %129 = arith.index_cast %128 : i32 to index
    %c0_58 = arith.constant 0 : index
    %c0_59 = arith.constant 0 : index
    %130 = vector.load %arg2[%129, %c0_58, %c0_59] : memref<8x8x1xf32, #tpu.memory_space<vmem>>, vector<1x8x1xf32>
    %131 = vector.shape_cast %130 : vector<1x8x1xf32> to vector<8x1xf32>
    %132 = vector.broadcast %131 : vector<8x1xf32> to vector<8x32xf32>
    %133 = arith.mulf %123, %132 : vector<8x32xf32>
    %cst_60 = arith.constant dense<0.000000e+00> : vector<8x32xf32>
    %134 = tpu.matmul %133, %36, %cst_60 {dimension_numbers = #tpu.dot_dimension_numbers<[1], [0], [0], [1], [0, 0, 1, 1], [], []>} : vector<8x32xf32>, vector<32x32xf32>, vector<8x32xf32> -> vector<8x32xf32>
    %cst_61 = arith.constant dense<0.000000e+00> : vector<8x32xf32>
    %135 = tpu.matmul %133, %38, %cst_61 {dimension_numbers = #tpu.dot_dimension_numbers<[1], [0], [0], [1], [0, 0, 1, 1], [], []>} : vector<8x32xf32>, vector<32x32xf32>, vector<8x32xf32> -> vector<8x32xf32>
    %cst_62 = arith.constant dense<0.000000e+00> : vector<8x32xf32>
    %136 = tpu.matmul %133, %40, %cst_62 {dimension_numbers = #tpu.dot_dimension_numbers<[1], [0], [0], [1], [0, 0, 1, 1], [], []>} : vector<8x32xf32>, vector<32x32xf32>, vector<8x32xf32> -> vector<8x32xf32>
    %137 = vector.broadcast %41 : vector<1x32xf32> to vector<8x32xf32>
    %138 = arith.addf %136, %137 : vector<8x32xf32>
    %139 = arith.index_cast %c2_i32 : i32 to index
    %c0_63 = arith.constant 0 : index
    %c0_64 = arith.constant 0 : index
    %140 = vector.load %arg11[%139, %c0_63, %c0_64] : memref<8x8x32xf32, #tpu.memory_space<vmem>>, vector<1x8x32xf32>
    %141 = vector.shape_cast %140 : vector<1x8x32xf32> to vector<8x32xf32>
    %142 = arith.addf %141, %134 : vector<8x32xf32>
    %143 = arith.negf %142 : vector<8x32xf32>
    %144 = math.exp %143 : vector<8x32xf32>
    %cst_65 = arith.constant 1.000000e+00 : f32
    %145 = vector.broadcast %cst_65 : f32 to vector<8x32xf32>
    %146 = arith.addf %145, %144 : vector<8x32xf32>
    %147 = arith.divf %145, %146 : vector<8x32xf32>
    %148 = arith.index_cast %c2_i32 : i32 to index
    %c0_66 = arith.constant 0 : index
    %c0_67 = arith.constant 0 : index
    %149 = vector.load %arg12[%148, %c0_66, %c0_67] : memref<8x8x32xf32, #tpu.memory_space<vmem>>, vector<1x8x32xf32>
    %150 = vector.shape_cast %149 : vector<1x8x32xf32> to vector<8x32xf32>
    %151 = arith.addf %150, %135 : vector<8x32xf32>
    %152 = arith.negf %151 : vector<8x32xf32>
    %153 = math.exp %152 : vector<8x32xf32>
    %cst_68 = arith.constant 1.000000e+00 : f32
    %154 = vector.broadcast %cst_68 : f32 to vector<8x32xf32>
    %155 = arith.addf %154, %153 : vector<8x32xf32>
    %156 = arith.divf %154, %155 : vector<8x32xf32>
    %157 = arith.index_cast %c2_i32 : i32 to index
    %c0_69 = arith.constant 0 : index
    %c0_70 = arith.constant 0 : index
    %158 = vector.load %arg13[%157, %c0_69, %c0_70] : memref<8x8x32xf32, #tpu.memory_space<vmem>>, vector<1x8x32xf32>
    %159 = vector.shape_cast %158 : vector<1x8x32xf32> to vector<8x32xf32>
    %160 = arith.mulf %147, %138 : vector<8x32xf32>
    %161 = arith.addf %159, %160 : vector<8x32xf32>
    %162 = math.tanh %161 : vector<8x32xf32>
    %163 = arith.subf %133, %162 : vector<8x32xf32>
    %164 = arith.mulf %156, %163 : vector<8x32xf32>
    %165 = arith.addf %162, %164 : vector<8x32xf32>
    %166 = arith.index_cast %c2_i32 : i32 to index
    %c0_71 = arith.constant 0 : index
    %c0_72 = arith.constant 0 : index
    %167 = vector.load %arg8[%166, %c0_71, %c0_72] : memref<8x8x32xf32, #tpu.memory_space<vmem>>, vector<1x8x32xf32>
    %168 = vector.shape_cast %167 : vector<1x8x32xf32> to vector<8x32xf32>
    %169 = vector.shape_cast %165 : vector<8x32xf32> to vector<1x8x32xf32>
    tpu.vector_store %arg8[%166, %c0_71, %c0_72], %169 {strides = array<i32>} : memref<8x8x32xf32, #tpu.memory_space<vmem>>, vector<1x8x32xf32>,
    %c3_i32 = arith.constant 3 : i32
    %170 = arith.addi %42, %c3_i32 : i32
    %171 = arith.index_cast %170 : i32 to index
    %c0_73 = arith.constant 0 : index
    %c0_74 = arith.constant 0 : index
    %172 = vector.load %arg2[%171, %c0_73, %c0_74] : memref<8x8x1xf32, #tpu.memory_space<vmem>>, vector<1x8x1xf32>
    %173 = vector.shape_cast %172 : vector<1x8x1xf32> to vector<8x1xf32>
    %174 = vector.broadcast %173 : vector<8x1xf32> to vector<8x32xf32>
    %175 = arith.mulf %165, %174 : vector<8x32xf32>
    %cst_75 = arith.constant dense<0.000000e+00> : vector<8x32xf32>
    %176 = tpu.matmul %175, %36, %cst_75 {dimension_numbers = #tpu.dot_dimension_numbers<[1], [0], [0], [1], [0, 0, 1, 1], [], []>} : vector<8x32xf32>, vector<32x32xf32>, vector<8x32xf32> -> vector<8x32xf32>
    %cst_76 = arith.constant dense<0.000000e+00> : vector<8x32xf32>
    %177 = tpu.matmul %175, %38, %cst_76 {dimension_numbers = #tpu.dot_dimension_numbers<[1], [0], [0], [1], [0, 0, 1, 1], [], []>} : vector<8x32xf32>, vector<32x32xf32>, vector<8x32xf32> -> vector<8x32xf32>
    %cst_77 = arith.constant dense<0.000000e+00> : vector<8x32xf32>
    %178 = tpu.matmul %175, %40, %cst_77 {dimension_numbers = #tpu.dot_dimension_numbers<[1], [0], [0], [1], [0, 0, 1, 1], [], []>} : vector<8x32xf32>, vector<32x32xf32>, vector<8x32xf32> -> vector<8x32xf32>
    %179 = vector.broadcast %41 : vector<1x32xf32> to vector<8x32xf32>
    %180 = arith.addf %178, %179 : vector<8x32xf32>
    %181 = arith.index_cast %c3_i32 : i32 to index
    %c0_78 = arith.constant 0 : index
    %c0_79 = arith.constant 0 : index
    %182 = vector.load %arg11[%181, %c0_78, %c0_79] : memref<8x8x32xf32, #tpu.memory_space<vmem>>, vector<1x8x32xf32>
    %183 = vector.shape_cast %182 : vector<1x8x32xf32> to vector<8x32xf32>
    %184 = arith.addf %183, %176 : vector<8x32xf32>
    %185 = arith.negf %184 : vector<8x32xf32>
    %186 = math.exp %185 : vector<8x32xf32>
    %cst_80 = arith.constant 1.000000e+00 : f32
    %187 = vector.broadcast %cst_80 : f32 to vector<8x32xf32>
    %188 = arith.addf %187, %186 : vector<8x32xf32>
    %189 = arith.divf %187, %188 : vector<8x32xf32>
    %190 = arith.index_cast %c3_i32 : i32 to index
    %c0_81 = arith.constant 0 : index
    %c0_82 = arith.constant 0 : index
    %191 = vector.load %arg12[%190, %c0_81, %c0_82] : memref<8x8x32xf32, #tpu.memory_space<vmem>>, vector<1x8x32xf32>
    %192 = vector.shape_cast %191 : vector<1x8x32xf32> to vector<8x32xf32>
    %193 = arith.addf %192, %177 : vector<8x32xf32>
    %194 = arith.negf %193 : vector<8x32xf32>
    %195 = math.exp %194 : vector<8x32xf32>
    %cst_83 = arith.constant 1.000000e+00 : f32
    %196 = vector.broadcast %cst_83 : f32 to vector<8x32xf32>
    %197 = arith.addf %196, %195 : vector<8x32xf32>
    %198 = arith.divf %196, %197 : vector<8x32xf32>
    %199 = arith.index_cast %c3_i32 : i32 to index
    %c0_84 = arith.constant 0 : index
    %c0_85 = arith.constant 0 : index
    %200 = vector.load %arg13[%199, %c0_84, %c0_85] : memref<8x8x32xf32, #tpu.memory_space<vmem>>, vector<1x8x32xf32>
    %201 = vector.shape_cast %200 : vector<1x8x32xf32> to vector<8x32xf32>
    %202 = arith.mulf %189, %180 : vector<8x32xf32>
    %203 = arith.addf %201, %202 : vector<8x32xf32>
    %204 = math.tanh %203 : vector<8x32xf32>
    %205 = arith.subf %175, %204 : vector<8x32xf32>
    %206 = arith.mulf %198, %205 : vector<8x32xf32>
    %207 = arith.addf %204, %206 : vector<8x32xf32>
    %208 = arith.index_cast %c3_i32 : i32 to index
    %c0_86 = arith.constant 0 : index
    %c0_87 = arith.constant 0 : index
    %209 = vector.load %arg8[%208, %c0_86, %c0_87] : memref<8x8x32xf32, #tpu.memory_space<vmem>>, vector<1x8x32xf32>
    %210 = vector.shape_cast %209 : vector<1x8x32xf32> to vector<8x32xf32>
    %211 = vector.shape_cast %207 : vector<8x32xf32> to vector<1x8x32xf32>
    tpu.vector_store %arg8[%208, %c0_86, %c0_87], %211 {strides = array<i32>} : memref<8x8x32xf32, #tpu.memory_space<vmem>>, vector<1x8x32xf32>,
    %c4_i32 = arith.constant 4 : i32
    %212 = arith.addi %42, %c4_i32 : i32
    %213 = arith.index_cast %212 : i32 to index
    %c0_88 = arith.constant 0 : index
    %c0_89 = arith.constant 0 : index
    %214 = vector.load %arg2[%213, %c0_88, %c0_89] : memref<8x8x1xf32, #tpu.memory_space<vmem>>, vector<1x8x1xf32>
    %215 = vector.shape_cast %214 : vector<1x8x1xf32> to vector<8x1xf32>
    %216 = vector.broadcast %215 : vector<8x1xf32> to vector<8x32xf32>
    %217 = arith.mulf %207, %216 : vector<8x32xf32>
    %cst_90 = arith.constant dense<0.000000e+00> : vector<8x32xf32>
    %218 = tpu.matmul %217, %36, %cst_90 {dimension_numbers = #tpu.dot_dimension_numbers<[1], [0], [0], [1], [0, 0, 1, 1], [], []>} : vector<8x32xf32>, vector<32x32xf32>, vector<8x32xf32> -> vector<8x32xf32>
    %cst_91 = arith.constant dense<0.000000e+00> : vector<8x32xf32>
    %219 = tpu.matmul %217, %38, %cst_91 {dimension_numbers = #tpu.dot_dimension_numbers<[1], [0], [0], [1], [0, 0, 1, 1], [], []>} : vector<8x32xf32>, vector<32x32xf32>, vector<8x32xf32> -> vector<8x32xf32>
    %cst_92 = arith.constant dense<0.000000e+00> : vector<8x32xf32>
    %220 = tpu.matmul %217, %40, %cst_92 {dimension_numbers = #tpu.dot_dimension_numbers<[1], [0], [0], [1], [0, 0, 1, 1], [], []>} : vector<8x32xf32>, vector<32x32xf32>, vector<8x32xf32> -> vector<8x32xf32>
    %221 = vector.broadcast %41 : vector<1x32xf32> to vector<8x32xf32>
    %222 = arith.addf %220, %221 : vector<8x32xf32>
    %223 = arith.index_cast %c4_i32 : i32 to index
    %c0_93 = arith.constant 0 : index
    %c0_94 = arith.constant 0 : index
    %224 = vector.load %arg11[%223, %c0_93, %c0_94] : memref<8x8x32xf32, #tpu.memory_space<vmem>>, vector<1x8x32xf32>
    %225 = vector.shape_cast %224 : vector<1x8x32xf32> to vector<8x32xf32>
    %226 = arith.addf %225, %218 : vector<8x32xf32>
    %227 = arith.negf %226 : vector<8x32xf32>
    %228 = math.exp %227 : vector<8x32xf32>
    %cst_95 = arith.constant 1.000000e+00 : f32
    %229 = vector.broadcast %cst_95 : f32 to vector<8x32xf32>
    %230 = arith.addf %229, %228 : vector<8x32xf32>
    %231 = arith.divf %229, %230 : vector<8x32xf32>
    %232 = arith.index_cast %c4_i32 : i32 to index
    %c0_96 = arith.constant 0 : index
    %c0_97 = arith.constant 0 : index
    %233 = vector.load %arg12[%232, %c0_96, %c0_97] : memref<8x8x32xf32, #tpu.memory_space<vmem>>, vector<1x8x32xf32>
    %234 = vector.shape_cast %233 : vector<1x8x32xf32> to vector<8x32xf32>
    %235 = arith.addf %234, %219 : vector<8x32xf32>
    %236 = arith.negf %235 : vector<8x32xf32>
    %237 = math.exp %236 : vector<8x32xf32>
    %cst_98 = arith.constant 1.000000e+00 : f32
    %238 = vector.broadcast %cst_98 : f32 to vector<8x32xf32>
    %239 = arith.addf %238, %237 : vector<8x32xf32>
    %240 = arith.divf %238, %239 : vector<8x32xf32>
    %241 = arith.index_cast %c4_i32 : i32 to index
    %c0_99 = arith.constant 0 : index
    %c0_100 = arith.constant 0 : index
    %242 = vector.load %arg13[%241, %c0_99, %c0_100] : memref<8x8x32xf32, #tpu.memory_space<vmem>>, vector<1x8x32xf32>
    %243 = vector.shape_cast %242 : vector<1x8x32xf32> to vector<8x32xf32>
    %244 = arith.mulf %231, %222 : vector<8x32xf32>
    %245 = arith.addf %243, %244 : vector<8x32xf32>
    %246 = math.tanh %245 : vector<8x32xf32>
    %247 = arith.subf %217, %246 : vector<8x32xf32>
    %248 = arith.mulf %240, %247 : vector<8x32xf32>
    %249 = arith.addf %246, %248 : vector<8x32xf32>
    %250 = arith.index_cast %c4_i32 : i32 to index
    %c0_101 = arith.constant 0 : index
    %c0_102 = arith.constant 0 : index
    %251 = vector.load %arg8[%250, %c0_101, %c0_102] : memref<8x8x32xf32, #tpu.memory_space<vmem>>, vector<1x8x32xf32>
    %252 = vector.shape_cast %251 : vector<1x8x32xf32> to vector<8x32xf32>
    %253 = vector.shape_cast %249 : vector<8x32xf32> to vector<1x8x32xf32>
    tpu.vector_store %arg8[%250, %c0_101, %c0_102], %253 {strides = array<i32>} : memref<8x8x32xf32, #tpu.memory_space<vmem>>, vector<1x8x32xf32>,
    %c5_i32 = arith.constant 5 : i32
    %254 = arith.addi %42, %c5_i32 : i32
    %255 = arith.index_cast %254 : i32 to index
    %c0_103 = arith.constant 0 : index
    %c0_104 = arith.constant 0 : index
    %256 = vector.load %arg2[%255, %c0_103, %c0_104] : memref<8x8x1xf32, #tpu.memory_space<vmem>>, vector<1x8x1xf32>
    %257 = vector.shape_cast %256 : vector<1x8x1xf32> to vector<8x1xf32>
    %258 = vector.broadcast %257 : vector<8x1xf32> to vector<8x32xf32>
    %259 = arith.mulf %249, %258 : vector<8x32xf32>
    %cst_105 = arith.constant dense<0.000000e+00> : vector<8x32xf32>
    %260 = tpu.matmul %259, %36, %cst_105 {dimension_numbers = #tpu.dot_dimension_numbers<[1], [0], [0], [1], [0, 0, 1, 1], [], []>} : vector<8x32xf32>, vector<32x32xf32>, vector<8x32xf32> -> vector<8x32xf32>
    %cst_106 = arith.constant dense<0.000000e+00> : vector<8x32xf32>
    %261 = tpu.matmul %259, %38, %cst_106 {dimension_numbers = #tpu.dot_dimension_numbers<[1], [0], [0], [1], [0, 0, 1, 1], [], []>} : vector<8x32xf32>, vector<32x32xf32>, vector<8x32xf32> -> vector<8x32xf32>
    %cst_107 = arith.constant dense<0.000000e+00> : vector<8x32xf32>
    %262 = tpu.matmul %259, %40, %cst_107 {dimension_numbers = #tpu.dot_dimension_numbers<[1], [0], [0], [1], [0, 0, 1, 1], [], []>} : vector<8x32xf32>, vector<32x32xf32>, vector<8x32xf32> -> vector<8x32xf32>
    %263 = vector.broadcast %41 : vector<1x32xf32> to vector<8x32xf32>
    %264 = arith.addf %262, %263 : vector<8x32xf32>
    %265 = arith.index_cast %c5_i32 : i32 to index
    %c0_108 = arith.constant 0 : index
    %c0_109 = arith.constant 0 : index
    %266 = vector.load %arg11[%265, %c0_108, %c0_109] : memref<8x8x32xf32, #tpu.memory_space<vmem>>, vector<1x8x32xf32>
    %267 = vector.shape_cast %266 : vector<1x8x32xf32> to vector<8x32xf32>
    %268 = arith.addf %267, %260 : vector<8x32xf32>
    %269 = arith.negf %268 : vector<8x32xf32>
    %270 = math.exp %269 : vector<8x32xf32>
    %cst_110 = arith.constant 1.000000e+00 : f32
    %271 = vector.broadcast %cst_110 : f32 to vector<8x32xf32>
    %272 = arith.addf %271, %270 : vector<8x32xf32>
    %273 = arith.divf %271, %272 : vector<8x32xf32>
    %274 = arith.index_cast %c5_i32 : i32 to index
    %c0_111 = arith.constant 0 : index
    %c0_112 = arith.constant 0 : index
    %275 = vector.load %arg12[%274, %c0_111, %c0_112] : memref<8x8x32xf32, #tpu.memory_space<vmem>>, vector<1x8x32xf32>
    %276 = vector.shape_cast %275 : vector<1x8x32xf32> to vector<8x32xf32>
    %277 = arith.addf %276, %261 : vector<8x32xf32>
    %278 = arith.negf %277 : vector<8x32xf32>
    %279 = math.exp %278 : vector<8x32xf32>
    %cst_113 = arith.constant 1.000000e+00 : f32
    %280 = vector.broadcast %cst_113 : f32 to vector<8x32xf32>
    %281 = arith.addf %280, %279 : vector<8x32xf32>
    %282 = arith.divf %280, %281 : vector<8x32xf32>
    %283 = arith.index_cast %c5_i32 : i32 to index
    %c0_114 = arith.constant 0 : index
    %c0_115 = arith.constant 0 : index
    %284 = vector.load %arg13[%283, %c0_114, %c0_115] : memref<8x8x32xf32, #tpu.memory_space<vmem>>, vector<1x8x32xf32>
    %285 = vector.shape_cast %284 : vector<1x8x32xf32> to vector<8x32xf32>
    %286 = arith.mulf %273, %264 : vector<8x32xf32>
    %287 = arith.addf %285, %286 : vector<8x32xf32>
    %288 = math.tanh %287 : vector<8x32xf32>
    %289 = arith.subf %259, %288 : vector<8x32xf32>
    %290 = arith.mulf %282, %289 : vector<8x32xf32>
    %291 = arith.addf %288, %290 : vector<8x32xf32>
    %292 = arith.index_cast %c5_i32 : i32 to index
    %c0_116 = arith.constant 0 : index
    %c0_117 = arith.constant 0 : index
    %293 = vector.load %arg8[%292, %c0_116, %c0_117] : memref<8x8x32xf32, #tpu.memory_space<vmem>>, vector<1x8x32xf32>
    %294 = vector.shape_cast %293 : vector<1x8x32xf32> to vector<8x32xf32>
    %295 = vector.shape_cast %291 : vector<8x32xf32> to vector<1x8x32xf32>
    tpu.vector_store %arg8[%292, %c0_116, %c0_117], %295 {strides = array<i32>} : memref<8x8x32xf32, #tpu.memory_space<vmem>>, vector<1x8x32xf32>,
    %c6_i32 = arith.constant 6 : i32
    %296 = arith.addi %42, %c6_i32 : i32
    %297 = arith.index_cast %296 : i32 to index
    %c0_118 = arith.constant 0 : index
    %c0_119 = arith.constant 0 : index
    %298 = vector.load %arg2[%297, %c0_118, %c0_119] : memref<8x8x1xf32, #tpu.memory_space<vmem>>, vector<1x8x1xf32>
    %299 = vector.shape_cast %298 : vector<1x8x1xf32> to vector<8x1xf32>
    %300 = vector.broadcast %299 : vector<8x1xf32> to vector<8x32xf32>
    %301 = arith.mulf %291, %300 : vector<8x32xf32>
    %cst_120 = arith.constant dense<0.000000e+00> : vector<8x32xf32>
    %302 = tpu.matmul %301, %36, %cst_120 {dimension_numbers = #tpu.dot_dimension_numbers<[1], [0], [0], [1], [0, 0, 1, 1], [], []>} : vector<8x32xf32>, vector<32x32xf32>, vector<8x32xf32> -> vector<8x32xf32>
    %cst_121 = arith.constant dense<0.000000e+00> : vector<8x32xf32>
    %303 = tpu.matmul %301, %38, %cst_121 {dimension_numbers = #tpu.dot_dimension_numbers<[1], [0], [0], [1], [0, 0, 1, 1], [], []>} : vector<8x32xf32>, vector<32x32xf32>, vector<8x32xf32> -> vector<8x32xf32>
    %cst_122 = arith.constant dense<0.000000e+00> : vector<8x32xf32>
    %304 = tpu.matmul %301, %40, %cst_122 {dimension_numbers = #tpu.dot_dimension_numbers<[1], [0], [0], [1], [0, 0, 1, 1], [], []>} : vector<8x32xf32>, vector<32x32xf32>, vector<8x32xf32> -> vector<8x32xf32>
    %305 = vector.broadcast %41 : vector<1x32xf32> to vector<8x32xf32>
    %306 = arith.addf %304, %305 : vector<8x32xf32>
    %307 = arith.index_cast %c6_i32 : i32 to index
    %c0_123 = arith.constant 0 : index
    %c0_124 = arith.constant 0 : index
    %308 = vector.load %arg11[%307, %c0_123, %c0_124] : memref<8x8x32xf32, #tpu.memory_space<vmem>>, vector<1x8x32xf32>
    %309 = vector.shape_cast %308 : vector<1x8x32xf32> to vector<8x32xf32>
    %310 = arith.addf %309, %302 : vector<8x32xf32>
    %311 = arith.negf %310 : vector<8x32xf32>
    %312 = math.exp %311 : vector<8x32xf32>
    %cst_125 = arith.constant 1.000000e+00 : f32
    %313 = vector.broadcast %cst_125 : f32 to vector<8x32xf32>
    %314 = arith.addf %313, %312 : vector<8x32xf32>
    %315 = arith.divf %313, %314 : vector<8x32xf32>
    %316 = arith.index_cast %c6_i32 : i32 to index
    %c0_126 = arith.constant 0 : index
    %c0_127 = arith.constant 0 : index
    %317 = vector.load %arg12[%316, %c0_126, %c0_127] : memref<8x8x32xf32, #tpu.memory_space<vmem>>, vector<1x8x32xf32>
    %318 = vector.shape_cast %317 : vector<1x8x32xf32> to vector<8x32xf32>
    %319 = arith.addf %318, %303 : vector<8x32xf32>
    %320 = arith.negf %319 : vector<8x32xf32>
    %321 = math.exp %320 : vector<8x32xf32>
    %cst_128 = arith.constant 1.000000e+00 : f32
    %322 = vector.broadcast %cst_128 : f32 to vector<8x32xf32>
    %323 = arith.addf %322, %321 : vector<8x32xf32>
    %324 = arith.divf %322, %323 : vector<8x32xf32>
    %325 = arith.index_cast %c6_i32 : i32 to index
    %c0_129 = arith.constant 0 : index
    %c0_130 = arith.constant 0 : index
    %326 = vector.load %arg13[%325, %c0_129, %c0_130] : memref<8x8x32xf32, #tpu.memory_space<vmem>>, vector<1x8x32xf32>
    %327 = vector.shape_cast %326 : vector<1x8x32xf32> to vector<8x32xf32>
    %328 = arith.mulf %315, %306 : vector<8x32xf32>
    %329 = arith.addf %327, %328 : vector<8x32xf32>
    %330 = math.tanh %329 : vector<8x32xf32>
    %331 = arith.subf %301, %330 : vector<8x32xf32>
    %332 = arith.mulf %324, %331 : vector<8x32xf32>
    %333 = arith.addf %330, %332 : vector<8x32xf32>
    %334 = arith.index_cast %c6_i32 : i32 to index
    %c0_131 = arith.constant 0 : index
    %c0_132 = arith.constant 0 : index
    %335 = vector.load %arg8[%334, %c0_131, %c0_132] : memref<8x8x32xf32, #tpu.memory_space<vmem>>, vector<1x8x32xf32>
    %336 = vector.shape_cast %335 : vector<1x8x32xf32> to vector<8x32xf32>
    %337 = vector.shape_cast %333 : vector<8x32xf32> to vector<1x8x32xf32>
    tpu.vector_store %arg8[%334, %c0_131, %c0_132], %337 {strides = array<i32>} : memref<8x8x32xf32, #tpu.memory_space<vmem>>, vector<1x8x32xf32>,
    %c7_i32 = arith.constant 7 : i32
    %338 = arith.addi %42, %c7_i32 : i32
    %339 = arith.index_cast %338 : i32 to index
    %c0_133 = arith.constant 0 : index
    %c0_134 = arith.constant 0 : index
    %340 = vector.load %arg2[%339, %c0_133, %c0_134] : memref<8x8x1xf32, #tpu.memory_space<vmem>>, vector<1x8x1xf32>
    %341 = vector.shape_cast %340 : vector<1x8x1xf32> to vector<8x1xf32>
    %342 = vector.broadcast %341 : vector<8x1xf32> to vector<8x32xf32>
    %343 = arith.mulf %333, %342 : vector<8x32xf32>
    %cst_135 = arith.constant dense<0.000000e+00> : vector<8x32xf32>
    %344 = tpu.matmul %343, %36, %cst_135 {dimension_numbers = #tpu.dot_dimension_numbers<[1], [0], [0], [1], [0, 0, 1, 1], [], []>} : vector<8x32xf32>, vector<32x32xf32>, vector<8x32xf32> -> vector<8x32xf32>
    %cst_136 = arith.constant dense<0.000000e+00> : vector<8x32xf32>
    %345 = tpu.matmul %343, %38, %cst_136 {dimension_numbers = #tpu.dot_dimension_numbers<[1], [0], [0], [1], [0, 0, 1, 1], [], []>} : vector<8x32xf32>, vector<32x32xf32>, vector<8x32xf32> -> vector<8x32xf32>
    %cst_137 = arith.constant dense<0.000000e+00> : vector<8x32xf32>
    %346 = tpu.matmul %343, %40, %cst_137 {dimension_numbers = #tpu.dot_dimension_numbers<[1], [0], [0], [1], [0, 0, 1, 1], [], []>} : vector<8x32xf32>, vector<32x32xf32>, vector<8x32xf32> -> vector<8x32xf32>
    %347 = vector.broadcast %41 : vector<1x32xf32> to vector<8x32xf32>
    %348 = arith.addf %346, %347 : vector<8x32xf32>
    %349 = arith.index_cast %c7_i32 : i32 to index
    %c0_138 = arith.constant 0 : index
    %c0_139 = arith.constant 0 : index
    %350 = vector.load %arg11[%349, %c0_138, %c0_139] : memref<8x8x32xf32, #tpu.memory_space<vmem>>, vector<1x8x32xf32>
    %351 = vector.shape_cast %350 : vector<1x8x32xf32> to vector<8x32xf32>
    %352 = arith.addf %351, %344 : vector<8x32xf32>
    %353 = arith.negf %352 : vector<8x32xf32>
    %354 = math.exp %353 : vector<8x32xf32>
    %cst_140 = arith.constant 1.000000e+00 : f32
    %355 = vector.broadcast %cst_140 : f32 to vector<8x32xf32>
    %356 = arith.addf %355, %354 : vector<8x32xf32>
    %357 = arith.divf %355, %356 : vector<8x32xf32>
    %358 = arith.index_cast %c7_i32 : i32 to index
    %c0_141 = arith.constant 0 : index
    %c0_142 = arith.constant 0 : index
    %359 = vector.load %arg12[%358, %c0_141, %c0_142] : memref<8x8x32xf32, #tpu.memory_space<vmem>>, vector<1x8x32xf32>
    %360 = vector.shape_cast %359 : vector<1x8x32xf32> to vector<8x32xf32>
    %361 = arith.addf %360, %345 : vector<8x32xf32>
    %362 = arith.negf %361 : vector<8x32xf32>
    %363 = math.exp %362 : vector<8x32xf32>
    %cst_143 = arith.constant 1.000000e+00 : f32
    %364 = vector.broadcast %cst_143 : f32 to vector<8x32xf32>
    %365 = arith.addf %364, %363 : vector<8x32xf32>
    %366 = arith.divf %364, %365 : vector<8x32xf32>
    %367 = arith.index_cast %c7_i32 : i32 to index
    %c0_144 = arith.constant 0 : index
    %c0_145 = arith.constant 0 : index
    %368 = vector.load %arg13[%367, %c0_144, %c0_145] : memref<8x8x32xf32, #tpu.memory_space<vmem>>, vector<1x8x32xf32>
    %369 = vector.shape_cast %368 : vector<1x8x32xf32> to vector<8x32xf32>
    %370 = arith.mulf %357, %348 : vector<8x32xf32>
    %371 = arith.addf %369, %370 : vector<8x32xf32>
    %372 = math.tanh %371 : vector<8x32xf32>
    %373 = arith.subf %343, %372 : vector<8x32xf32>
    %374 = arith.mulf %366, %373 : vector<8x32xf32>
    %375 = arith.addf %372, %374 : vector<8x32xf32>
    %376 = arith.index_cast %c7_i32 : i32 to index
    %c0_146 = arith.constant 0 : index
    %c0_147 = arith.constant 0 : index
    %377 = vector.load %arg8[%376, %c0_146, %c0_147] : memref<8x8x32xf32, #tpu.memory_space<vmem>>, vector<1x8x32xf32>
    %378 = vector.shape_cast %377 : vector<1x8x32xf32> to vector<8x32xf32>
    %379 = vector.shape_cast %375 : vector<8x32xf32> to vector<1x8x32xf32>
    tpu.vector_store %arg8[%376, %c0_146, %c0_147], %379 {strides = array<i32>} : memref<8x8x32xf32, #tpu.memory_space<vmem>>, vector<1x8x32xf32>,
    %c8_i32_148 = arith.constant 8 : i32
    %c0_149 = arith.constant 0 : index
    %c0_150 = arith.constant 0 : index
    %380 = vector.load %arg10[%c0_149, %c0_150] : memref<8x32xf32, #tpu.memory_space<vmem>>, vector<8x32xf32>
    tpu.vector_store %arg10[%c0_149, %c0_150], %375 {strides = array<i32>} : memref<8x32xf32, #tpu.memory_space<vmem>>, vector<8x32xf32>,
    %c0_i32_151 = arith.constant 0 : i32
    %381 = arith.cmpi eq, %arg0, %c0_i32_151 : i32
    %382 = arith.extui %381 : i1 to i32
    %c0_i32_152 = arith.constant 0 : i32
    %383 = arith.cmpi ne, %382, %c0_i32_152 : i32
    scf.if %383 {
      %c0_153 = arith.constant 0 : index
      %c0_154 = arith.constant 0 : index
      %384 = vector.load %arg9[%c0_153, %c0_154] : memref<8x32xf32, #tpu.memory_space<vmem>>, vector<8x32xf32>
      tpu.vector_store %arg9[%c0_153, %c0_154], %375 {strides = array<i32>} : memref<8x32xf32, #tpu.memory_space<vmem>>, vector<8x32xf32>,
    } else {
    }
    return
  }
  func.func @transform_0(%arg0: i32) -> (i32, i32, i32) {
    %c0_i32 = arith.constant 0 : i32
    %c0_i32_0 = arith.constant 0 : i32
    %c0_i32_1 = arith.constant 0 : i32
    return %arg0, %c0_i32, %c0_i32_0 : i32, i32, i32
  }
  func.func @transform_1(%arg0: i32) -> (i32, i32, i32) {
    %c0_i32 = arith.constant 0 : i32
    %c0_i32_0 = arith.constant 0 : i32
    %c0_i32_1 = arith.constant 0 : i32
    %c0_i32_2 = arith.constant 0 : i32
    return %c0_i32, %c0_i32_0, %c0_i32_1 : i32, i32, i32
  }
  func.func @transform_2(%arg0: i32) -> (i32, i32) {
    %c0_i32 = arith.constant 0 : i32
    %c0_i32_0 = arith.constant 0 : i32
    %c0_i32_1 = arith.constant 0 : i32
    return %c0_i32, %c0_i32_0 : i32, i32
  }
  func.func @transform_3(%arg0: i32) -> (i32, i32, i32) {
    %c0_i32 = arith.constant 0 : i32
    %c0_i32_0 = arith.constant 0 : i32
    %c0_i32_1 = arith.constant 0 : i32
    %c0_i32_2 = arith.constant 0 : i32
    return %c0_i32, %c0_i32_0, %c0_i32_1 : i32, i32, i32
  }
  func.func @transform_4(%arg0: i32) -> (i32, i32, i32) {
    %c0_i32 = arith.constant 0 : i32
    %c0_i32_0 = arith.constant 0 : i32
    %c0_i32_1 = arith.constant 0 : i32
    %c0_i32_2 = arith.constant 0 : i32
    return %c0_i32, %c0_i32_0, %c0_i32_1 : i32, i32, i32
  }
  func.func @transform_5(%arg0: i32) -> (i32, i32, i32) {
    %c0_i32 = arith.constant 0 : i32
    %c0_i32_0 = arith.constant 0 : i32
    %c0_i32_1 = arith.constant 0 : i32
    %c0_i32_2 = arith.constant 0 : i32
    return %c0_i32, %c0_i32_0, %c0_i32_1 : i32, i32, i32
  }
  func.func @transform_6(%arg0: i32) -> (i32, i32) {
    %c0_i32 = arith.constant 0 : i32
    %c0_i32_0 = arith.constant 0 : i32
    %c0_i32_1 = arith.constant 0 : i32
    return %c0_i32, %c0_i32_0 : i32, i32
  }
  func.func @transform_7(%arg0: i32) -> (i32, i32, i32) {
    %c0_i32 = arith.constant 0 : i32
    %c0_i32_0 = arith.constant 0 : i32
    %c0_i32_1 = arith.constant 0 : i32
    return %arg0, %c0_i32, %c0_i32_0 : i32, i32, i32
  }
  func.func @transform_8(%arg0: i32) -> (i32, i32) {
    %c0_i32 = arith.constant 0 : i32
    %c0_i32_0 = arith.constant 0 : i32
    %c0_i32_1 = arith.constant 0 : i32
    return %c0_i32, %c0_i32_0 : i32, i32
  }
}

</mosaic_0001>

<bundles_post_ra>
// kernel: gru_rnn_block.1
= control target key start
LH: loop header
LB: loop body
LE: loop exit
PB: predicated region body
PF: predicated region fallthrough
CT: control target
= control target key end

     0   :  { %14 = vsyncpa [#allocation7], 0  ;;  %s2036_s0 = inlined_call_operand.vmem [shape: f32[8,8,32], index: 0, kind: input, shape index: {}]   ;;  %s2037_s1 = inlined_call_operand.vmem [shape: f32[8,8,1], index: 1, kind: input, shape index: {}]   ;;  %s2038_s2 = inlined_call_operand.vmem [shape: f32[8,32], index: 2, kind: input, shape index: {}]   ;;  %s2039_s3 = inlined_call_operand.hbm [shape: f32[3,32,32], index: 3, kind: input, shape index: {}]   ;;  %s2040_s4 = inlined_call_operand.hbm [shape: f32[3,32,32], index: 4, kind: input, shape index: {}]   ;;  %s2041_s5 = inlined_call_operand.vmem [shape: f32[3,1,32], index: 5, kind: input, shape index: {}]   ;;  %s2042_s6 = inlined_call_operand.vmem [shape: f32[1,32], index: 6, kind: input, shape index: {}]   ;;  %s2043_s7 = inlined_call_operand.hbm [shape: f32[8,8,32], index: 7, kind: output, shape index: {0}]   ;;  %s2044_s8 = inlined_call_operand.hbm [shape: f32[8,32], index: 8, kind: output, shape index: {1}]  }
   0x1   :  { %15 = vsyncpa [#allocation10], 0 }
   0x2   :  { %16 = vsyncpa [#allocation8], 0 }
   0x3   :  { %17 = vsyncpa [#allocation13], 0  ;;  %s28_s29 = sshll.u32 %s2039_s3, 4  ;;  %s1622_s30 = smov [#allocation6]   ;;  %s29_s29 = int_to_ptr.hbm [resolvable:$true] %s28_s29 }
   0x4   :  { %s30_s9 = sshll.u32 %s1622_s30, 4  ;;  %s41_s12 = sshll.u32 %s2040_s4, 4  ;;  %s31_s9 = int_to_ptr.vmem [resolvable:$true] %s30_s9  ;;  %s42_s12 = int_to_ptr.hbm [resolvable:$true] %s41_s12 }
   0x5   :  { %s1623_s13 = smov 128   ;;  %s1624_s14 = smov 8  }
   0x6   :  { %36 = dma.hbm_to_vmem [thread:$0]  %s29_s29, 1536, %s31_s9, [#allocation7], %s1623_s13, %s1623_s13, %s1624_s14  }
   0x7   :  { %s1625_s15 = smov [#allocation9]  }
   0x8   :  { %s43_s16 = sshll.u32 %s1625_s15, 4  ;;  %s44_s16 = int_to_ptr.vmem [resolvable:$true] %s43_s16 }
   0x9   :  { %49 = dma.hbm_to_vmem [thread:$0]  %s42_s12, 1536, %s44_s16, [#allocation10], %s1623_s13, %s1623_s13, %s1624_s14  }
   0xa   :  { %1614 = dma.done.wait [#allocation7], 1536  }
   0xb   :  { %1615 = vsyncadd [#allocation7], 4294965760 }
   0xc   :  { %1616 = dma.done.wait [#allocation10], 1536  }
   0xd   :  { %1617 = vsyncadd [#allocation10], 4294965760  ;;  %v1626_v0 = vmov 0   ;;  %v290_v1 = vld [vmem:[%s2037_s1] sm:$0xff]  ;;  %v79_v3 = vld [vmem:[#allocation6 + $0x10] sm:$0xff]  ;;  %vm67_vm0 = vcmask 261120  }
   0xe   :  { %1428 = vset.pattern.permute.xlu0 %v1626_v0  ;;  %1429 = vset.pattern.permute.xlu1 %v1626_v0  ;;  %v80_v2 = vld [vmem:[#allocation6 + $0x18] sm:$0xff]  ;;  %v1691_v5 = vld [vmem:[#allocation9 + $0x10] sm:$0xff]  ;;  %v78_v6 = vld [vmem:[#allocation6 + $0x8] sm:$0xff]  ;;  %s1313_s12 = sshll.u32 %s2043_s7, 4  ;;  %s1628_s15 = smov [#allocation12]   ;;  %s1314_s12 = int_to_ptr.hbm [resolvable:$true] %s1313_s12 }
   0xf   :  { %1430 = vset.pattern.permute.xlu2 %v1626_v0  ;;  %293 = vperm.xlu0 %1428, %v290_v1   ;;  %v1689_v4 = vld [vmem:[#allocation9 + $0x18] sm:$0xff]  ;;  %v77_v7 = vld [vmem:[#allocation6] sm:$0xff]  ;;  %v1409_v10 = vld [vmem:[%s2037_s1 + $0x30] sm:$0xff]  ;;  %s1325_s16 = sshll.u32 %s1628_s15, 4  ;;  %s1327_s17 = sshll.u32 %s2044_s8, 4  ;;  %s1326_s16 = int_to_ptr.vmem [resolvable:$true] %s1325_s16  ;;  %s1328_s17 = int_to_ptr.hbm [resolvable:$true] %s1327_s17 }
  0x10   :  { %132 = vmatpush.msra.mxu0 %v80_v2  ;;  %312 = vmatpush.msra.mxu3 %v1689_v4  ;;  %v1379_v8 = vld [vmem:[%s2037_s1 + $0x8] sm:$0xff]  ;;  %v69_v9 = vld [vmem:[%s2036_s0] sm:$0xff]  ;;  %v1709_v13 = vld [vmem:[#allocation9 + $0x8] sm:$0xff] }
  0x11   :  { %v66_v11 = vld [vmem:[%s2038_s2] sm:$0xff]  ;;  %v83_v14 = vld [vmem:[#allocation6 + $0x30] sm:$0xff]  ;;  %v1712_v15 = vld [vmem:[#allocation9] sm:$0xff] }
  0x12   :  { %133 = vmatpush.msra.mxu0 %v79_v3  ;;  %313 = vmatpush.msra.mxu3 %v1691_v5  ;;  %68 = vst.msk [vmem:[#allocation2] sm:$0xff] %vm67_vm0, %v66_v11  ;;  %v84_v12 = vld [vmem:[#allocation6 + $0x38] sm:$0xff]  ;;  %v82_v16 = vld [vmem:[#allocation6 + $0x28] sm:$0xff]  ;;  %v81_v18 = vld [vmem:[#allocation6 + $0x20] sm:$0xff] }
  0x13   :  { %184 = vmatpush.msra.mxu1 %v84_v12  ;;  %v1715_v17 = vld [vmem:[#allocation9 + $0x38] sm:$0xff]  ;;  %v1718_v19 = vld [vmem:[#allocation9 + $0x30] sm:$0xff]  ;;  %v1722_v20 = vld [vmem:[#allocation9 + $0x28] sm:$0xff] }
  0x14   :  { %134 = vmatpush.msra.mxu0 %v78_v6  ;;  %314 = vmatpush.msra.mxu3 %v1709_v13  ;;  %v1725_v21 = vld [vmem:[#allocation9 + $0x20] sm:$0xff]  ;;  %v1730_v22 = vld [vmem:[#allocation9 + $0x58] sm:$0xff]  ;;  %v1734_v23 = vld [vmem:[#allocation9 + $0x50] sm:$0xff] }
  0x15   :  { %185 = vmatpush.msra.mxu1 %v83_v14  ;;  %v1738_v24 = vld [vmem:[#allocation9 + $0x48] sm:$0xff]  ;;  %v88_v25 = vld [vmem:[#allocation6 + $0x58] sm:$0xff]  ;;  %v1742_v26 = vld [vmem:[#allocation9 + $0x40] sm:$0xff] }
  0x16   :  { %135 = vmatpush.msra.mxu0 %v77_v7  ;;  %315 = vmatpush.msra.mxu3 %v1712_v15  ;;  %v87_v27 = vld [vmem:[#allocation6 + $0x50] sm:$0xff]  ;;  %v86_v28 = vld [vmem:[#allocation6 + $0x48] sm:$0xff]  ;;  %v85_v29 = vld [vmem:[#allocation6 + $0x40] sm:$0xff] }
  0x17   :  { %419 = vperm.xlu0 %1428, %v1379_v8   ;;  %1350 = vmatmul.msk.f32.vlgmr.msra.gmra.mxu0 %vm67_vm0, %v69_v9  ;;  %v1776_v33 = vld [vmem:[%s2041_s5] ss:$0 sm:$0xff]  ;;  %v1791_v36 = vld [vmem:[%s2041_s5 + $0x1] ss:$0 sm:$0xff]  ;;  %v1798_v39 = vld [vmem:[%s2041_s5 + $0x2] ss:$0 sm:$0xff] }
  0x18   :  { %186 = vmatpush.msra.mxu1 %v82_v16  ;;  %332 = vmatpush.msrb.mxu3 %v1715_v17  ;;  %v70_v46 = vld [vmem:[%s2036_s0 + $0x8] sm:$0xff]  ;;  %v1811_v59 = vld [vmem:[%s2042_s6] ss:$0 sm:$0xff]  ;;  %v1385_v14 = vld [vmem:[%s2037_s1 + $0x10] sm:$0xff] }
  0x19   :  { %605 = vmatpush.msrb.mxu0 %v1730_v22  ;;  %236 = vmatpush.msra.mxu2 %v88_v25  ;;  %v287_v30 = vld [vmem:[#allocation2] sm:$0xff] }
  0x1a   :  { %187 = vmatpush.msra.mxu1 %v81_v18  ;;  %333 = vmatpush.msrb.mxu3 %v1718_v19 }
  0x1b   :  { %1358 = vmatmul.msk.f32.vlgmr.msra.gmra.mxu1 %vm67_vm0, %v69_v9  ;;  %606 = vmatpush.msrb.mxu0 %v1734_v23 }
  0x1c   :  { %334 = vmatpush.msrb.mxu3 %v1722_v20  ;;  %692 = vmatpush.msrb.mxu1 %v1689_v4 }
  0x1d   :  { %607 = vmatpush.msrb.mxu0 %v1738_v24  ;;  %237 = vmatpush.msra.mxu2 %v87_v27 }
  0x1e   :  { %335 = vmatpush.msrb.mxu3 %v1725_v21  ;;  %693 = vmatpush.msrb.mxu1 %v1691_v5 }
  0x1f   :  { %1054 = vperm.xlu0 %1428, %v1409_v10   ;;  %608 = vmatpush.msrb.mxu0 %v1742_v26 }
  0x20   :  { %694 = vmatpush.msrb.mxu1 %v1709_v13  ;;  %238 = vmatpush.msra.mxu2 %v86_v28  ;;  %v1391_v28 = vld [vmem:[%s2037_s1 + $0x18] sm:$0xff] }
  0x21   :  { %819 = vmatpush.msra.mxu0 %v1689_v4  ;;  %546 = vperm.xlu1 %1429, %v1385_v14  }
  0x22   :  { %695 = vmatpush.msrb.mxu1 %v1712_v15  ;;  %239 = vmatpush.msra.mxu2 %v85_v29 }
  0x23   :  { %820 = vmatpush.msra.mxu0 %v1691_v5  ;;  %1366 = vmatmul.msk.f32.vlgmr.msra.gmra.mxu2 %vm67_vm0, %v69_v9 }
  0x24   :  { %839 = vmatpush.msra.mxu1 %v1715_v17  ;;  %712 = vmatpush.msrb.mxu2 %v1715_v17 }
  0x25   :  { %821 = vmatpush.msra.mxu0 %v1709_v13  ;;  %1359 = vmatmul.msk.f32.gmra.mxu1 %vm67_vm0, %v70_v46 }
  0x26   :  { %840 = vmatpush.msra.mxu1 %v1718_v19  ;;  %713 = vmatpush.msrb.mxu2 %v1718_v19 }
  0x27   :  { %822 = vmatpush.msra.mxu0 %v1712_v15 }
  0x28   :  { %841 = vmatpush.msra.mxu1 %v1722_v20  ;;  %714 = vmatpush.msrb.mxu2 %v1722_v20 }
  0x29   :  { %1351 = vmatmul.msk.f32.gmra.mxu0 %vm67_vm0, %v70_v46  ;;  %673 = vperm.xlu1 %1429, %v1391_v28  }
  0x2a   :  { %842 = vmatpush.msra.mxu1 %v1725_v21  ;;  %715 = vmatpush.msrb.mxu2 %v1725_v21 }
  0x2b   :  { %1367 = vmatmul.msk.f32.gmra.mxu2 %vm67_vm0, %v70_v46  ;;  %v72_v46 = vld [vmem:[%s2036_s0 + $0x18] sm:$0xff] }
  0x2c   :  { %859 = vmatpush.msra.mxu2 %v1730_v22 }
  0x2e   :  { %860 = vmatpush.msra.mxu2 %v1734_v23 }
  0x30   :  { %861 = vmatpush.msra.mxu2 %v1738_v24 }
  0x32   :  { %862 = vmatpush.msra.mxu2 %v1742_v26 }
  0x81   :  { %v294_v31 = vpop.permute.xlu0 %293 }
  0x82   :  { %v1757_v32 = vmul.f32 %v294_v31, %v287_v30 }
  0x84   :  { %1374 = vmatmul.msk.f32.vlgmr.msra.gmra.mxu3 %vm67_vm0, %v1757_v32 }
  0x85   :  { %355 = vmatpush.msra.mxu3 %v1730_v22 }
  0x87   :  { %356 = vmatpush.msra.mxu3 %v1734_v23 }
  0x89   :  { %357 = vmatpush.msra.mxu3 %v1738_v24 }
  0x8b   :  { %358 = vmatpush.msra.mxu3 %v1742_v26 }
  0x8c   :  { %1375 = vmatmul.msk.f32.vlgmr.msrb.gmra.mxu3 %vm67_vm0, %v1757_v32 }
  0x8d   :  { %438 = vmatpush.msrb.mxu3 %v1689_v4 }
  0x8f   :  { %439 = vmatpush.msrb.mxu3 %v1691_v5 }
  0x91   :  { %440 = vmatpush.msrb.mxu3 %v1709_v13 }
  0x93   :  { %441 = vmatpush.msrb.mxu3 %v1712_v15 }
  0x94   :  { %1376 = vmatmul.msk.f32.vlgmr.msra.gmra.mxu3 %vm67_vm0, %v1757_v32  ;;  %v137_v34 = vpop.f32.mrf.mxu0 }
  0x95   :  { %v138_v35 = vadd.f32 %v1776_v33, %v137_v34  ;;  %458 = vmatpush.msra.mxu3 %v1715_v17 }
  0x97   :  { %161 = vst.msk [vmem:[#allocation3] sm:$0xff] %vm67_vm0, %v138_v35  ;;  %459 = vmatpush.msra.mxu3 %v1718_v19 }
  0x98   :  { %v189_v37 = vpop.f32.mrf.mxu1 }
  0x99   :  { %460 = vmatpush.msra.mxu3 %v1722_v20  ;;  %v190_v38 = vadd.f32 %v1791_v36, %v189_v37 }
  0x9b   :  { %461 = vmatpush.msra.mxu3 %v1725_v21  ;;  %213 = vst.msk [vmem:[#allocation4] sm:$0xff] %vm67_vm0, %v190_v38  ;;  %v420_v38 = vpop.permute.xlu0 %419 }
  0x9e   :  { %v363_v42 = vld [vmem:[#allocation3] sm:$0xff] }
  0xa2   :  { %v384_v47 = vld [vmem:[#allocation4] sm:$0xff] }
  0xa6   :  { %v241_v40 = vpop.f32.mrf.mxu2 }
  0xa7   :  { %v242_v41 = vadd.f32 %v1798_v39, %v241_v40 }
  0xa9   :  { %265 = vst.msk [vmem:[#allocation5] sm:$0xff] %vm67_vm0, %v242_v41  ;;  %v1415_v41 = vld [vmem:[%s2037_s1 + $0x38] sm:$0xff] }
  0xaa   :  { %1181 = vperm.xlu1 %1429, %v1415_v41  }
  0xb0   :  { %v405_v8 = vld [vmem:[#allocation5] sm:$0xff] }
 0x107   :  { %v317_v43 = vpop.f32.mrf.mxu3 }
 0x108   :  { %v364_v44 = vadd.f32 %v363_v42, %v317_v43  ;;  %v192_v42 = vpop.f32.mrf.mxu1 }
 0x10a   :  { %v1377_v45 = vmul.f32 -1.442695, %v364_v44  ;;  %v193_v44 = vadd.f32 %v1791_v36, %v192_v42 }
 0x10c   :  { %1435 = vpow2.f32 %v1377_v45  ;;  %214 = vst.msk [vmem:[#allocation4 + $0x8] sm:$0xff] %vm67_vm0, %v193_v44  ;;  %v71_v45 = vld [vmem:[%s2036_s0 + $0x10] sm:$0xff] }
 0x10d   :  { %1352 = vmatmul.msk.f32.gmra.mxu0 %vm67_vm0, %v71_v45  ;;  %1360 = vmatmul.msk.f32.gmra.mxu1 %vm67_vm0, %v71_v45 }
 0x10e   :  { %1368 = vmatmul.msk.f32.gmra.mxu2 %vm67_vm0, %v71_v45 }
 0x10f   :  { %v337_v48 = vpop.f32.mrf.mxu3 }
 0x110   :  { %v385_v49 = vadd.f32 %v384_v47, %v337_v48  ;;  %v73_v47 = vld [vmem:[%s2036_s0 + $0x20] sm:$0xff]  ;;  %v244_v48 = vpop.f32.mrf.mxu2 }
 0x112   :  { %v1436_v50 = vpop.eup %1435  ;;  %v1378_v51 = vmul.f32 -1.442695, %v385_v49  ;;  %v245_v49 = vadd.f32 %v1798_v39, %v244_v48 }
 0x113   :  { %v368_v52 = vadd.f32 1.0, %v1436_v50  ;;  %v74_v50 = vld [vmem:[%s2036_s0 + $0x28] sm:$0xff] }
 0x114   :  { %1437 = vpow2.f32 %v1378_v51  ;;  %266 = vst.msk [vmem:[#allocation5 + $0x8] sm:$0xff] %vm67_vm0, %v245_v49 }
 0x115   :  { %1439 = vrcp.f32 %v368_v52  ;;  %v380_v58 = vand.u32 2147483648, %v368_v52  ;;  %v378_v61 = vand.u32 2147483647, %v368_v52  ;;  %vm374_vm2 = vweird.f32 %v368_v52  ;;  %1353 = vmatmul.msk.f32.gmra.mxu0 %vm67_vm0, %v72_v46  ;;  %1361 = vmatmul.msk.f32.gmra.mxu1 %vm67_vm0, %v72_v46 }
 0x116   :  { %1369 = vmatmul.msk.f32.gmra.mxu2 %vm67_vm0, %v72_v46 }
 0x117   :  { %v360_v62 = vpop.f32.mrf.mxu3  ;;  %v381_v1 = vor.u32 1.1754944e-38, %v380_v58  ;;  %vm379_vm4 = vcmp.eq.f32.partialorder %v378_v61, 8.507059e+37 }
 0x118   :  { %v361_v3 = vadd.f32 %v1811_v59, %v360_v62 }
 0x11a   :  { %v1438_v53 = vpop.eup %1437 }
 0x11b   :  { %v1440_v54 = vpop.eup %1439  ;;  %v389_v55 = vadd.f32 1.0, %v1438_v53  ;;  %v531_v28 = vld [vmem:[#allocation5 + $0x8] sm:$0xff] }
 0x11c   :  { %v370_v56 = vmul.f32 %v1440_v54, %v368_v52  ;;  %vm375_vm1 = vweird.f32 %v1440_v54 }
 0x11d   :  { %1441 = vrcp.f32 %v389_v55  ;;  %vm376_vm3 = vmor %vm374_vm2, %vm375_vm1  ;;  %v401_v18 = vand.u32 2147483648, %v389_v55  ;;  %vm395_vm6 = vweird.f32 %v389_v55  ;;  %v399_v25 = vand.u32 2147483647, %v389_v55  ;;  %1354 = vmatmul.msk.f32.gmra.mxu0 %vm67_vm0, %v73_v47  ;;  %1362 = vmatmul.msk.f32.gmra.mxu1 %vm67_vm0, %v73_v47 }
 0x11e   :  { %v371_v57 = vsub.f32 1.0, %v370_v56  ;;  %1370 = vmatmul.msk.f32.gmra.mxu2 %vm67_vm0, %v73_v47  ;;  %v509_v56 = vld [vmem:[#allocation4 + $0x8] sm:$0xff]  ;;  %v547_v47 = vpop.permute.xlu1 %546 }
 0x11f   :  { %v402_v30 = vor.u32 1.1754944e-38, %v401_v18  ;;  %vm400_vm8 = vcmp.eq.f32.partialorder %v399_v25, 8.507059e+37 }
 0x120   :  { %v372_v60 = vmul.f32 %v1440_v54, %v371_v57 }
 0x122   :  { %v373_v63 = vadd.f32 %v1440_v54, %v372_v60  ;;  %v76_v60 = vld [vmem:[%s2036_s0 + $0x38] sm:$0xff] }
 0x123   :  { %v1442_v0 = vpop.eup %1441 }
 0x124   :  { %v391_v2 = vmul.f32 %v1442_v0, %v389_v55  ;;  %v377_v6 = vsel %vm376_vm3, %v1440_v54, %v373_v63  ;;  %vm396_vm5 = vweird.f32 %v1442_v0  ;;  %v75_v54 = vld [vmem:[%s2036_s0 + $0x30] sm:$0xff] }
 0x125   :  { %v382_v7 = vsel %vm379_vm4, %v381_v1, %v377_v6  ;;  %vm397_vm7 = vmor %vm395_vm6, %vm396_vm5  ;;  %1355 = vmatmul.msk.f32.gmra.mxu0 %vm67_vm0, %v74_v50  ;;  %1363 = vmatmul.msk.f32.gmra.mxu1 %vm67_vm0, %v74_v50 }
 0x126   :  { %v392_v9 = vsub.f32 1.0, %v391_v2  ;;  %v406_v10 = vmul.f32 %v382_v7, %v361_v3  ;;  %1371 = vmatmul.msk.f32.gmra.mxu2 %vm67_vm0, %v74_v50 }
 0x128   :  { %v393_v11 = vmul.f32 %v1442_v0, %v392_v9  ;;  %v407_v12 = vadd.f32 %v406_v10, %v405_v8 }
 0x12a   :  { %1443 = vtanh.f32 %v407_v12  ;;  %v394_v16 = vadd.f32 %v1442_v0, %v393_v11 }
 0x12c   :  { %v398_v27 = vsel %vm397_vm7, %v1442_v0, %v394_v16 }
 0x12d   :  { %v403_v34 = vsel %vm400_vm8, %v402_v30, %v398_v27  ;;  %1356 = vmatmul.msk.f32.gmra.mxu0 %vm67_vm0, %v75_v54  ;;  %1364 = vmatmul.msk.f32.gmra.mxu1 %vm67_vm0, %v75_v54 }
 0x12e   :  { %1372 = vmatmul.msk.f32.gmra.mxu2 %vm67_vm0, %v75_v54 }
 0x130   :  { %v1444_v29 = vpop.eup %1443 }
 0x131   :  { %v409_v31 = vsub.f32 %v1757_v32, %v1444_v29  ;;  %v140_v32 = vpop.f32.mrf.mxu0 }
 0x132   :  { %v141_v43 = vadd.f32 %v1776_v33, %v140_v32 }
 0x133   :  { %v410_v35 = vmul.f32 %v409_v31, %v403_v34 }
 0x134   :  { %162 = vst.msk [vmem:[#allocation3 + $0x8] sm:$0xff] %vm67_vm0, %v141_v43 }
 0x135   :  { %v411_v37 = vadd.f32 %v1444_v29, %v410_v35  ;;  %1357 = vmatmul.msk.f32.gmra.mxu0 %vm67_vm0, %v76_v60  ;;  %1365 = vmatmul.msk.f32.gmra.mxu1 %vm67_vm0, %v76_v60 }
 0x136   :  { %1373 = vmatmul.msk.f32.gmra.mxu2 %vm67_vm0, %v76_v60 }
 0x137   :  { %412 = vst.msk [vmem:[#allocation11] sm:$0xff] %vm67_vm0, %v411_v37  ;;  %v1822_v40 = vmul.f32 %v420_v38, %v411_v37 }
 0x139   :  { %1380 = vmatmul.msk.f32.vlgmr.msrb.gmra.mxu3 %vm67_vm0, %v1822_v40 }
 0x13a   :  { %478 = vmatpush.msrb.mxu3 %v1730_v22 }
 0x13b   :  { %v487_v51 = vld [vmem:[#allocation3 + $0x8] sm:$0xff] }
 0x13c   :  { %479 = vmatpush.msrb.mxu3 %v1734_v23 }
 0x13e   :  { %480 = vmatpush.msrb.mxu3 %v1738_v24 }
 0x140   :  { %481 = vmatpush.msrb.mxu3 %v1742_v26 }
 0x141   :  { %1381 = vmatmul.msk.f32.vlgmr.msra.gmra.mxu3 %vm67_vm0, %v1822_v40 }
 0x142   :  { %565 = vmatpush.msra.mxu3 %v1689_v4 }
 0x144   :  { %566 = vmatpush.msra.mxu3 %v1691_v5 }
 0x146   :  { %567 = vmatpush.msra.mxu3 %v1709_v13 }
 0x148   :  { %568 = vmatpush.msra.mxu3 %v1712_v15 }
 0x149   :  { %1382 = vmatmul.msk.f32.vlgmr.msrb.gmra.mxu3 %vm67_vm0, %v1822_v40 }
 0x14a   :  { %585 = vmatpush.msrb.mxu3 %v1715_v17 }
 0x14c   :  { %586 = vmatpush.msrb.mxu3 %v1718_v19 }
 0x14e   :  { %587 = vmatpush.msrb.mxu3 %v1722_v20 }
 0x150   :  { %588 = vmatpush.msrb.mxu3 %v1725_v21 }
 0x1bc   :  { %v443_v52 = vpop.f32.mrf.mxu3 }
 0x1bd   :  { %v488_v53 = vadd.f32 %v487_v51, %v443_v52 }
 0x1bf   :  { %v1383_v55 = vmul.f32 -1.442695, %v488_v53 }
 0x1c1   :  { %1445 = vpow2.f32 %v1383_v55 }
 0x1c4   :  { %v463_v57 = vpop.f32.mrf.mxu3 }
 0x1c5   :  { %v510_v58 = vadd.f32 %v509_v56, %v463_v57 }
 0x1c7   :  { %v1446_v61 = vpop.eup %1445  ;;  %v1384_v62 = vmul.f32 -1.442695, %v510_v58 }
 0x1c8   :  { %v492_v63 = vadd.f32 1.0, %v1446_v61  ;;  %v195_v61 = vpop.f32.mrf.mxu1 }
 0x1c9   :  { %1447 = vpow2.f32 %v1384_v62  ;;  %v196_v62 = vadd.f32 %v1791_v36, %v195_v61 }
 0x1ca   :  { %1449 = vrcp.f32 %v492_v63  ;;  %v504_v7 = vand.u32 2147483648, %v492_v63  ;;  %v502_v9 = vand.u32 2147483647, %v492_v63  ;;  %vm498_vm10 = vweird.f32 %v492_v63 }
 0x1cb   :  { %215 = vst.msk [vmem:[#allocation4 + $0x10] sm:$0xff] %vm67_vm0, %v196_v62 }
 0x1cc   :  { %v483_v10 = vpop.f32.mrf.mxu3  ;;  %v505_v14 = vor.u32 1.1754944e-38, %v504_v7  ;;  %vm503_vm12 = vcmp.eq.f32.partialorder %v502_v9, 8.507059e+37 }
 0x1cd   :  { %v484_v18 = vadd.f32 %v1811_v59, %v483_v10 }
 0x1cf   :  { %v1448_v0 = vpop.eup %1447 }
 0x1d0   :  { %v1450_v1 = vpop.eup %1449  ;;  %v514_v2 = vadd.f32 1.0, %v1448_v0 }
 0x1d1   :  { %v494_v3 = vmul.f32 %v1450_v1, %v492_v63  ;;  %vm499_vm9 = vweird.f32 %v1450_v1  ;;  %v247_v63 = vpop.f32.mrf.mxu2 }
 0x1d2   :  { %1451 = vrcp.f32 %v514_v2  ;;  %vm500_vm11 = vmor %vm498_vm10, %vm499_vm9  ;;  %v526_v37 = vand.u32 2147483648, %v514_v2  ;;  %vm520_vm14 = vweird.f32 %v514_v2  ;;  %v524_v38 = vand.u32 2147483647, %v514_v2  ;;  %v636_v7 = vld [vmem:[#allocation4 + $0x10] sm:$0xff] }
 0x1d3   :  { %v495_v6 = vsub.f32 1.0, %v494_v3  ;;  %v248_v0 = vadd.f32 %v1798_v39, %v247_v63 }
 0x1d4   :  { %v527_v42 = vor.u32 1.1754944e-38, %v526_v37  ;;  %vm525_vm1 = vcmp.eq.f32.partialorder %v524_v38, 8.507059e+37  ;;  %v1403_v38 = vld [vmem:[%s2037_s1 + $0x28] sm:$0xff] }
 0x1d5   :  { %v496_v8 = vmul.f32 %v1450_v1, %v495_v6  ;;  %267 = vst.msk [vmem:[#allocation5 + $0x10] sm:$0xff] %vm67_vm0, %v248_v0 }
 0x1d7   :  { %v497_v11 = vadd.f32 %v1450_v1, %v496_v8 }
 0x1d8   :  { %v1452_v12 = vpop.eup %1451 }
 0x1d9   :  { %v516_v16 = vmul.f32 %v1452_v12, %v514_v2  ;;  %v501_v25 = vsel %vm500_vm11, %v1450_v1, %v497_v11  ;;  %vm521_vm13 = vweird.f32 %v1452_v12 }
 0x1da   :  { %v506_v27 = vsel %vm503_vm12, %v505_v14, %v501_v25  ;;  %vm522_vm15 = vmor %vm520_vm14, %vm521_vm13  ;;  %v1397_v14 = vld [vmem:[%s2037_s1 + $0x20] sm:$0xff] }
 0x1db   :  { %v532_v29 = vmul.f32 %v506_v27, %v484_v18  ;;  %v517_v30 = vsub.f32 1.0, %v516_v16  ;;  %v198_v16 = vpop.f32.mrf.mxu1  ;;  %v250_v18 = vpop.f32.mrf.mxu2  ;;  %800 = vperm.xlu2 %1430, %v1397_v14  }
 0x1dc   :  { %v674_v14 = vpop.permute.xlu1 %673 }
 0x1dd   :  { %v518_v31 = vmul.f32 %v1452_v12, %v517_v30  ;;  %v533_v34 = vadd.f32 %v532_v29, %v531_v28  ;;  %v199_v28 = vadd.f32 %v1791_v36, %v198_v16  ;;  %v251_v29 = vadd.f32 %v1798_v39, %v250_v18 }
 0x1df   :  { %1453 = vtanh.f32 %v533_v34  ;;  %v519_v35 = vadd.f32 %v1452_v12, %v518_v31  ;;  %216 = vst.msk [vmem:[#allocation4 + $0x18] sm:$0xff] %vm67_vm0, %v199_v28 }
 0x1e0   :  { %268 = vst.msk [vmem:[#allocation5 + $0x18] sm:$0xff] %vm67_vm0, %v251_v29 }
 0x1e1   :  { %v523_v41 = vsel %vm522_vm15, %v1452_v12, %v519_v35 }
 0x1e2   :  { %v528_v44 = vsel %vm525_vm1, %v527_v42, %v523_v41 }
 0x1e3   :  { %v201_v42 = vpop.f32.mrf.mxu1  ;;  %927 = vperm.xlu2 %1430, %v1403_v38  }
 0x1e5   :  { %v1454_v32 = vpop.eup %1453 }
 0x1e6   :  { %v535_v43 = vsub.f32 %v1822_v40, %v1454_v32  ;;  %v143_v40 = vpop.f32.mrf.mxu0 }
 0x1e7   :  { %v144_v49 = vadd.f32 %v1776_v33, %v143_v40 }
 0x1e8   :  { %v536_v45 = vmul.f32 %v535_v43, %v528_v44  ;;  %v253_v43 = vpop.f32.mrf.mxu2 }
 0x1e9   :  { %163 = vst.msk [vmem:[#allocation3 + $0x10] sm:$0xff] %vm67_vm0, %v144_v49 }
 0x1ea   :  { %v537_v46 = vadd.f32 %v1454_v32, %v536_v45 }
 0x1ec   :  { %539 = vst.msk [vmem:[#allocation11 + $0x8] sm:$0xff] %vm67_vm0, %v537_v46  ;;  %v1890_v48 = vmul.f32 %v547_v47, %v537_v46  ;;  %v202_v46 = vadd.f32 %v1791_v36, %v201_v42  ;;  %v254_v47 = vadd.f32 %v1798_v39, %v253_v43 }
 0x1ee   :  { %1386 = vmatmul.msk.f32.vlgmr.msra.gmra.mxu3 %vm67_vm0, %v1890_v48  ;;  %1388 = vmatmul.msk.f32.vlgmr.msrb.gmra.mxu0 %vm67_vm0, %v1890_v48  ;;  %v146_v50 = vpop.f32.mrf.mxu0  ;;  %217 = vst.msk [vmem:[#allocation4 + $0x20] sm:$0xff] %vm67_vm0, %v202_v46 }
 0x1ef   :  { %732 = vmatpush.msra.mxu3 %v1730_v22  ;;  %966 = vmatpush.msrb.mxu0 %v1715_v17  ;;  %v147_v51 = vadd.f32 %v1776_v33, %v146_v50  ;;  %269 = vst.msk [vmem:[#allocation5 + $0x20] sm:$0xff] %vm67_vm0, %v254_v47 }
 0x1f0   :  { %v614_v2 = vld [vmem:[#allocation3 + $0x10] sm:$0xff] }
 0x1f1   :  { %733 = vmatpush.msra.mxu3 %v1734_v23  ;;  %967 = vmatpush.msrb.mxu0 %v1718_v19  ;;  %164 = vst.msk [vmem:[#allocation3 + $0x18] sm:$0xff] %vm67_vm0, %v147_v51 }
 0x1f3   :  { %734 = vmatpush.msra.mxu3 %v1738_v24  ;;  %968 = vmatpush.msrb.mxu0 %v1722_v20 }
 0x1f5   :  { %735 = vmatpush.msra.mxu3 %v1742_v26  ;;  %969 = vmatpush.msrb.mxu0 %v1725_v21 }
 0x1f6   :  { %1387 = vmatmul.msk.f32.vlgmr.msrb.gmra.mxu3 %vm67_vm0, %v1890_v48  ;;  %v149_v52 = vpop.f32.mrf.mxu0 }
 0x1f7   :  { %946 = vmatpush.msrb.mxu3 %v1689_v4  ;;  %v150_v53 = vadd.f32 %v1776_v33, %v149_v52  ;;  %v658_v52 = vld [vmem:[#allocation5 + $0x10] sm:$0xff] }
 0x1f9   :  { %947 = vmatpush.msrb.mxu3 %v1691_v5  ;;  %165 = vst.msk [vmem:[#allocation3 + $0x20] sm:$0xff] %vm67_vm0, %v150_v53 }
 0x1fb   :  { %948 = vmatpush.msrb.mxu3 %v1709_v13 }
 0x1fd   :  { %949 = vmatpush.msrb.mxu3 %v1712_v15 }
 0x1fe   :  { %v152_v54 = vpop.f32.mrf.mxu0 }
 0x1ff   :  { %v153_v55 = vadd.f32 %v1776_v33, %v152_v54 }
 0x201   :  { %166 = vst.msk [vmem:[#allocation3 + $0x28] sm:$0xff] %vm67_vm0, %v153_v55 }
 0x206   :  { %v155_v56 = vpop.f32.mrf.mxu0 }
 0x207   :  { %v156_v57 = vadd.f32 %v1776_v33, %v155_v56 }
 0x209   :  { %167 = vst.msk [vmem:[#allocation3 + $0x30] sm:$0xff] %vm67_vm0, %v156_v57  ;;  %v204_v57 = vpop.f32.mrf.mxu1 }
 0x20a   :  { %v205_v61 = vadd.f32 %v1791_v36, %v204_v57 }
 0x20c   :  { %218 = vst.msk [vmem:[#allocation4 + $0x28] sm:$0xff] %vm67_vm0, %v205_v61 }
 0x20e   :  { %v158_v58 = vpop.f32.mrf.mxu0 }
 0x20f   :  { %v159_v60 = vadd.f32 %v1776_v33, %v158_v58  ;;  %v256_v58 = vpop.f32.mrf.mxu2 }
 0x210   :  { %v257_v62 = vadd.f32 %v1798_v39, %v256_v58  ;;  %v785_v58 = vld [vmem:[#allocation5 + $0x18] sm:$0xff] }
 0x211   :  { %168 = vst.msk [vmem:[#allocation3 + $0x38] sm:$0xff] %vm67_vm0, %v159_v60 }
 0x212   :  { %270 = vst.msk [vmem:[#allocation5 + $0x28] sm:$0xff] %vm67_vm0, %v257_v62 }
 0x26b   :  { %v610_v41 = vpop.f32.mrf.mxu0 }
 0x26c   :  { %v611_v40 = vadd.f32 %v1811_v59, %v610_v41 }
 0x271   :  { %v570_v1 = vpop.f32.mrf.mxu3 }
 0x272   :  { %v615_v3 = vadd.f32 %v614_v2, %v570_v1 }
 0x274   :  { %v1389_v6 = vmul.f32 -1.442695, %v615_v3 }
 0x276   :  { %1455 = vpow2.f32 %v1389_v6 }
 0x279   :  { %v590_v8 = vpop.f32.mrf.mxu3 }
 0x27a   :  { %v637_v33 = vadd.f32 %v636_v7, %v590_v8  ;;  %v207_v8 = vpop.f32.mrf.mxu1 }
 0x27c   :  { %v1456_v9 = vpop.eup %1455  ;;  %v1390_v10 = vmul.f32 -1.442695, %v637_v33  ;;  %v259_v33 = vpop.f32.mrf.mxu2 }
 0x27d   :  { %v619_v11 = vadd.f32 1.0, %v1456_v9 }
 0x27e   :  { %1457 = vpow2.f32 %v1390_v10  ;;  %v208_v10 = vadd.f32 %v1791_v36, %v207_v8 }
 0x27f   :  { %1459 = vrcp.f32 %v619_v11  ;;  %v631_v34 = vand.u32 2147483648, %v619_v11  ;;  %v629_v37 = vand.u32 2147483647, %v619_v11  ;;  %vm625_vm3 = vweird.f32 %v619_v11 }
 0x280   :  { %219 = vst.msk [vmem:[#allocation4 + $0x30] sm:$0xff] %vm67_vm0, %v208_v10 }
 0x281   :  { %v632_v45 = vor.u32 1.1754944e-38, %v631_v34  ;;  %vm630_vm5 = vcmp.eq.f32.partialorder %v629_v37, 8.507059e+37 }
 0x284   :  { %v1458_v12 = vpop.eup %1457  ;;  %v262_v18 = vpop.f32.mrf.mxu2 }
 0x285   :  { %v1460_v25 = vpop.eup %1459  ;;  %v641_v27 = vadd.f32 1.0, %v1458_v12 }
 0x286   :  { %v621_v30 = vmul.f32 %v1460_v25, %v619_v11  ;;  %vm626_vm2 = vweird.f32 %v1460_v25  ;;  %v260_v11 = vadd.f32 %v1798_v39, %v259_v33 }
 0x287   :  { %1461 = vrcp.f32 %v641_v27  ;;  %vm627_vm4 = vmor %vm625_vm3, %vm626_vm2  ;;  %v653_v63 = vand.u32 2147483648, %v641_v27  ;;  %vm647_vm7 = vweird.f32 %v641_v27  ;;  %v651_v0 = vand.u32 2147483647, %v641_v27 }
 0x288   :  { %v622_v31 = vsub.f32 1.0, %v621_v30  ;;  %271 = vst.msk [vmem:[#allocation5 + $0x30] sm:$0xff] %vm67_vm0, %v260_v11 }
 0x289   :  { %v654_v3 = vor.u32 1.1754944e-38, %v653_v63  ;;  %vm652_vm9 = vcmp.eq.f32.partialorder %v651_v0, 8.507059e+37 }
 0x28a   :  { %v623_v35 = vmul.f32 %v1460_v25, %v622_v31  ;;  %v763_v31 = vld [vmem:[#allocation4 + $0x18] sm:$0xff] }
 0x28c   :  { %v624_v32 = vadd.f32 %v1460_v25, %v623_v35 }
 0x28d   :  { %v1462_v44 = vpop.eup %1461 }
 0x28e   :  { %v628_v49 = vsel %vm627_vm4, %v1460_v25, %v624_v32  ;;  %v643_v50 = vmul.f32 %v1462_v44, %v641_v27  ;;  %vm648_vm6 = vweird.f32 %v1462_v44  ;;  %v263_v27 = vadd.f32 %v1798_v39, %v262_v18  ;;  %v741_v39 = vld [vmem:[#allocation3 + $0x18] sm:$0xff] }
 0x28f   :  { %v633_v51 = vsel %vm630_vm5, %v632_v45, %v628_v49  ;;  %vm649_vm8 = vmor %vm647_vm7, %vm648_vm6 }
 0x290   :  { %v644_v53 = vsub.f32 1.0, %v643_v50  ;;  %v659_v54 = vmul.f32 %v633_v51, %v611_v40  ;;  %272 = vst.msk [vmem:[#allocation5 + $0x38] sm:$0xff] %vm67_vm0, %v263_v27 }
 0x292   :  { %v645_v55 = vmul.f32 %v1462_v44, %v644_v53  ;;  %v660_v56 = vadd.f32 %v659_v54, %v658_v52 }
 0x294   :  { %1463 = vtanh.f32 %v660_v56  ;;  %v646_v60 = vadd.f32 %v1462_v44, %v645_v55 }
 0x296   :  { %v650_v1 = vsel %vm649_vm8, %v1462_v44, %v646_v60 }
 0x297   :  { %v655_v7 = vsel %vm652_vm9, %v654_v3, %v650_v1 }
 0x29a   :  { %v1464_v2 = vpop.eup %1463 }
 0x29b   :  { %v662_v6 = vsub.f32 %v1890_v48, %v1464_v2  ;;  %v210_v48 = vpop.f32.mrf.mxu1 }
 0x29c   :  { %v211_v25 = vadd.f32 %v1791_v36, %v210_v48 }
 0x29d   :  { %v663_v9 = vmul.f32 %v662_v6, %v655_v7 }
 0x29e   :  { %220 = vst.msk [vmem:[#allocation4 + $0x38] sm:$0xff] %vm67_vm0, %v211_v25 }
 0x29f   :  { %v664_v12 = vadd.f32 %v1464_v2, %v663_v9  ;;  %v801_v9 = vpop.permute.xlu2 %800 }
 0x2a1   :  { %666 = vst.msk [vmem:[#allocation11 + $0x10] sm:$0xff] %vm67_vm0, %v664_v12  ;;  %v1951_v16 = vmul.f32 %v674_v14, %v664_v12 }
 0x2a3   :  { %1392 = vmatmul.msk.f32.vlgmr.msrb.gmra.mxu1 %vm67_vm0, %v1951_v16  ;;  %1393 = vmatmul.msk.f32.vlgmr.msrb.gmra.mxu2 %vm67_vm0, %v1951_v16 }
 0x2a4   :  { %1394 = vmatmul.msk.f32.vlgmr.msra.gmra.mxu3 %vm67_vm0, %v1951_v16  ;;  %986 = vmatpush.msrb.mxu1 %v1730_v22 }
 0x2a5   :  { %1073 = vmatpush.msrb.mxu2 %v1689_v4  ;;  %1093 = vmatpush.msra.mxu3 %v1715_v17 }
 0x2a6   :  { %987 = vmatpush.msrb.mxu1 %v1734_v23 }
 0x2a7   :  { %1074 = vmatpush.msrb.mxu2 %v1691_v5  ;;  %1094 = vmatpush.msra.mxu3 %v1718_v19 }
 0x2a8   :  { %988 = vmatpush.msrb.mxu1 %v1738_v24 }
 0x2a9   :  { %1075 = vmatpush.msrb.mxu2 %v1709_v13  ;;  %1095 = vmatpush.msra.mxu3 %v1722_v20 }
 0x2aa   :  { %989 = vmatpush.msrb.mxu1 %v1742_v26 }
 0x2ab   :  { %1076 = vmatpush.msrb.mxu2 %v1712_v15  ;;  %1096 = vmatpush.msra.mxu3 %v1725_v21 }
 0x320   :  { %v697_v36 = vpop.f32.mrf.mxu1 }
 0x321   :  { %v742_v28 = vadd.f32 %v741_v39, %v697_v36 }
 0x323   :  { %v1395_v29 = vmul.f32 -1.442695, %v742_v28 }
 0x325   :  { %1465 = vpow2.f32 %v1395_v29 }
 0x326   :  { %v717_v30 = vpop.f32.mrf.mxu2 }
 0x327   :  { %v764_v34 = vadd.f32 %v763_v31, %v717_v30  ;;  %v737_v49 = vpop.f32.mrf.mxu3 }
 0x328   :  { %v738_v53 = vadd.f32 %v1811_v59, %v737_v49 }
 0x329   :  { %v1396_v35 = vmul.f32 -1.442695, %v764_v34 }
 0x32b   :  { %v1466_v37 = vpop.eup %1465  ;;  %1467 = vpow2.f32 %v1396_v35 }
 0x32c   :  { %v746_v38 = vadd.f32 1.0, %v1466_v37 }
 0x32e   :  { %1469 = vrcp.f32 %v746_v38  ;;  %v758_v45 = vand.u32 2147483648, %v746_v38  ;;  %v756_v47 = vand.u32 2147483647, %v746_v38  ;;  %vm752_vm11 = vweird.f32 %v746_v38 }
 0x330   :  { %v759_v52 = vor.u32 1.1754944e-38, %v758_v45  ;;  %vm757_vm13 = vcmp.eq.f32.partialorder %v756_v47, 8.507059e+37 }
 0x331   :  { %v1468_v41 = vpop.eup %1467 }
 0x332   :  { %v768_v32 = vadd.f32 1.0, %v1468_v41 }
 0x334   :  { %v1470_v42 = vpop.eup %1469  ;;  %1471 = vrcp.f32 %v768_v32  ;;  %v780_v63 = vand.u32 2147483648, %v768_v32  ;;  %vm774_vm15 = vweird.f32 %v768_v32  ;;  %v778_v0 = vand.u32 2147483647, %v768_v32 }
 0x335   :  { %v748_v43 = vmul.f32 %v1470_v42, %v746_v38  ;;  %vm753_vm10 = vweird.f32 %v1470_v42 }
 0x336   :  { %vm754_vm12 = vmor %vm752_vm11, %vm753_vm10  ;;  %v781_v3 = vor.u32 1.1754944e-38, %v780_v63  ;;  %vm779_vm2 = vcmp.eq.f32.partialorder %v778_v0, 8.507059e+37  ;;  %v995_v63 = vld [vmem:[#allocation3 + $0x28] sm:$0xff] }
 0x337   :  { %v749_v44 = vsub.f32 1.0, %v748_v43 }
 0x339   :  { %v750_v46 = vmul.f32 %v1470_v42, %v749_v44 }
 0x33a   :  { %v1472_v40 = vpop.eup %1471 }
 0x33b   :  { %v770_v50 = vmul.f32 %v1472_v40, %v768_v32  ;;  %v751_v51 = vadd.f32 %v1470_v42, %v750_v46  ;;  %vm775_vm14 = vweird.f32 %v1472_v40  ;;  %v912_v32 = vld [vmem:[#allocation5 + $0x20] sm:$0xff] }
 0x33c   :  { %vm776_vm1 = vmor %vm774_vm15, %vm775_vm14 }
 0x33d   :  { %v755_v54 = vsel %vm754_vm12, %v1470_v42, %v751_v51  ;;  %v771_v55 = vsub.f32 1.0, %v770_v50 }
 0x33e   :  { %v760_v56 = vsel %vm757_vm13, %v759_v52, %v755_v54 }
 0x33f   :  { %v786_v57 = vmul.f32 %v760_v56, %v738_v53  ;;  %v772_v60 = vmul.f32 %v1472_v40, %v771_v55  ;;  %v928_v53 = vpop.permute.xlu2 %927  ;;  %v1515_v55 = vld [vmem:[#allocation9 + $0x58] sm:$0xff]  ;;  %v1516_v56 = vld [vmem:[#allocation9 + $0x50] sm:$0xff] }
 0x341   :  { %v787_v61 = vadd.f32 %v786_v57, %v785_v58  ;;  %v773_v62 = vadd.f32 %v1472_v40, %v772_v60  ;;  %v1017_v58 = vld [vmem:[#allocation4 + $0x28] sm:$0xff] }
 0x343   :  { %1473 = vtanh.f32 %v787_v61  ;;  %v777_v1 = vsel %vm776_vm1, %v1472_v40, %v773_v62 }
 0x344   :  { %v782_v7 = vsel %vm779_vm2, %v781_v3, %v777_v1 }
 0x349   :  { %v1474_v2 = vpop.eup %1473 }
 0x34a   :  { %v789_v6 = vsub.f32 %v1951_v16, %v1474_v2 }
 0x34c   :  { %v790_v8 = vmul.f32 %v789_v6, %v782_v7 }
 0x34e   :  { %v791_v33 = vadd.f32 %v1474_v2, %v790_v8 }
 0x350   :  { %793 = vst.msk [vmem:[#allocation11 + $0x18] sm:$0xff] %vm67_vm0, %v791_v33  ;;  %v1978_v10 = vmul.f32 %v801_v9, %v791_v33 }
 0x352   :  { %1398 = vmatmul.msk.f32.vlgmr.msra.gmra.mxu0 %vm67_vm0, %v1978_v10  ;;  %1399 = vmatmul.msk.f32.vlgmr.msra.gmra.mxu1 %vm67_vm0, %v1978_v10 }
 0x353   :  { %1400 = vmatmul.msk.f32.vlgmr.msra.gmra.mxu2 %vm67_vm0, %v1978_v10  ;;  %1113 = vmatpush.msra.mxu0 %v1730_v22 }
 0x354   :  { %1200 = vmatpush.msra.mxu1 %v1689_v4  ;;  %1220 = vmatpush.msra.mxu2 %v1715_v17  ;;  %v868_v17 = vld [vmem:[#allocation3 + $0x20] sm:$0xff] }
 0x355   :  { %1114 = vmatpush.msra.mxu0 %v1734_v23  ;;  %v890_v23 = vld [vmem:[#allocation4 + $0x20] sm:$0xff] }
 0x356   :  { %1201 = vmatpush.msra.mxu1 %v1691_v5  ;;  %1221 = vmatpush.msra.mxu2 %v1718_v19 }
 0x357   :  { %1115 = vmatpush.msra.mxu0 %v1738_v24 }
 0x358   :  { %1202 = vmatpush.msra.mxu1 %v1709_v13  ;;  %1222 = vmatpush.msra.mxu2 %v1722_v20 }
 0x359   :  { %1116 = vmatpush.msra.mxu0 %v1742_v26 }
 0x35a   :  { %1203 = vmatpush.msra.mxu1 %v1712_v15  ;;  %1223 = vmatpush.msra.mxu2 %v1725_v21 }
 0x3cf   :  { %v824_v4 = vpop.f32.mrf.mxu0  ;;  %v844_v22 = vpop.f32.mrf.mxu1 }
 0x3d0   :  { %v869_v11 = vadd.f32 %v868_v17, %v824_v4  ;;  %v891_v5 = vadd.f32 %v890_v23, %v844_v22 }
 0x3d2   :  { %v1401_v12 = vmul.f32 -1.442695, %v869_v11  ;;  %v1402_v19 = vmul.f32 -1.442695, %v891_v5 }
 0x3d4   :  { %1475 = vpow2.f32 %v1401_v12 }
 0x3d5   :  { %1477 = vpow2.f32 %v1402_v19 }
 0x3d6   :  { %v864_v28 = vpop.f32.mrf.mxu2 }
 0x3d7   :  { %v865_v34 = vadd.f32 %v1811_v59, %v864_v28 }
 0x3da   :  { %v1476_v14 = vpop.eup %1475 }
 0x3db   :  { %v1478_v13 = vpop.eup %1477  ;;  %v873_v16 = vadd.f32 1.0, %v1476_v14 }
 0x3dc   :  { %v895_v20 = vadd.f32 1.0, %v1478_v13 }
 0x3dd   :  { %1479 = vrcp.f32 %v873_v16  ;;  %v885_v27 = vand.u32 2147483648, %v873_v16  ;;  %v883_v39 = vand.u32 2147483647, %v873_v16  ;;  %vm879_vm4 = vweird.f32 %v873_v16 }
 0x3de   :  { %1481 = vrcp.f32 %v895_v20  ;;  %v907_v44 = vand.u32 2147483648, %v895_v20  ;;  %vm901_vm8 = vweird.f32 %v895_v20  ;;  %v905_v45 = vand.u32 2147483647, %v895_v20 }
 0x3df   :  { %v886_v31 = vor.u32 1.1754944e-38, %v885_v27  ;;  %vm884_vm6 = vcmp.eq.f32.partialorder %v883_v39, 8.507059e+37 }
 0x3e0   :  { %v908_v40 = vor.u32 1.1754944e-38, %v907_v44  ;;  %vm906_vm10 = vcmp.eq.f32.partialorder %v905_v45, 8.507059e+37 }
 0x3e3   :  { %v1480_v48 = vpop.eup %1479 }
 0x3e4   :  { %v1482_v15 = vpop.eup %1481  ;;  %v875_v18 = vmul.f32 %v1480_v48, %v873_v16  ;;  %vm880_vm3 = vweird.f32 %v1480_v48 }
 0x3e5   :  { %v897_v25 = vmul.f32 %v1482_v15, %v895_v20  ;;  %vm881_vm5 = vmor %vm879_vm4, %vm880_vm3  ;;  %vm902_vm7 = vweird.f32 %v1482_v15  ;;  %v1039_v20 = vld [vmem:[#allocation5 + $0x28] sm:$0xff] }
 0x3e6   :  { %v876_v21 = vsub.f32 1.0, %v875_v18  ;;  %vm903_vm9 = vmor %vm901_vm8, %vm902_vm7 }
 0x3e7   :  { %v898_v30 = vsub.f32 1.0, %v897_v25 }
 0x3e8   :  { %v877_v36 = vmul.f32 %v1480_v48, %v876_v21 }
 0x3e9   :  { %v899_v41 = vmul.f32 %v1482_v15, %v898_v30  ;;  %v1055_v30 = vpop.permute.xlu0 %1054 }
 0x3ea   :  { %v878_v29 = vadd.f32 %v1480_v48, %v877_v36 }
 0x3eb   :  { %v900_v43 = vadd.f32 %v1482_v15, %v899_v41 }
 0x3ec   :  { %v882_v35 = vsel %vm881_vm5, %v1480_v48, %v878_v29 }
 0x3ed   :  { %v887_v37 = vsel %vm884_vm6, %v886_v31, %v882_v35  ;;  %v904_v46 = vsel %vm903_vm9, %v1482_v15, %v900_v43  ;;  %v1122_v35 = vld [vmem:[#allocation3 + $0x30] sm:$0xff] }
 0x3ee   :  { %v913_v38 = vmul.f32 %v887_v37, %v865_v34  ;;  %v909_v50 = vsel %vm906_vm10, %v908_v40, %v904_v46 }
 0x3f0   :  { %v914_v42 = vadd.f32 %v913_v38, %v912_v32  ;;  %v1144_v38 = vld [vmem:[#allocation4 + $0x30] sm:$0xff] }
 0x3f2   :  { %1483 = vtanh.f32 %v914_v42 }
 0x3f8   :  { %v1484_v47 = vpop.eup %1483 }
 0x3f9   :  { %v916_v49 = vsub.f32 %v1978_v10, %v1484_v47 }
 0x3fb   :  { %v917_v51 = vmul.f32 %v916_v49, %v909_v50 }
 0x3fd   :  { %v918_v52 = vadd.f32 %v1484_v47, %v917_v51 }
 0x3ff   :  { %920 = vst.msk [vmem:[#allocation11 + $0x20] sm:$0xff] %vm67_vm0, %v918_v52  ;;  %v2001_v54 = vmul.f32 %v928_v53, %v918_v52 }
 0x401   :  { %1404 = vmatmul.msk.f32.vlgmr.msrb.gmra.mxu3 %vm67_vm0, %v2001_v54  ;;  %1405 = vmatmul.msk.f32.vlgmr.msrb.gmra.mxu0 %vm67_vm0, %v2001_v54 }
 0x402   :  { %1406 = vmatmul.msk.f32.vlgmr.msrb.gmra.mxu1 %vm67_vm0, %v2001_v54  ;;  %1240 = vmatpush.msrb.mxu3 %v1515_v55 }
 0x404   :  { %1241 = vmatpush.msrb.mxu3 %v1516_v56 }
 0x406   :  { %1242 = vmatpush.msrb.mxu3 %v1738_v24 }
 0x408   :  { %1243 = vmatpush.msrb.mxu3 %v1742_v26 }
 0x47e   :  { %v971_v57 = vpop.f32.mrf.mxu0 }
 0x47f   :  { %v1018_v60 = vadd.f32 %v1017_v58, %v971_v57  ;;  %v991_v22 = vpop.f32.mrf.mxu1 }
 0x480   :  { %v992_v12 = vadd.f32 %v1811_v59, %v991_v22 }
 0x481   :  { %v1408_v61 = vmul.f32 -1.442695, %v1018_v60 }
 0x483   :  { %1485 = vpow2.f32 %v1408_v61  ;;  %v1517_v61 = vld [vmem:[%s2042_s6] ss:$0 sm:$0xff]  ;;  %s1627_s6 = smov [#allocation11]  }
 0x484   :  { %v951_v62 = vpop.f32.mrf.mxu3  ;;  %s1311_s5 = sshll.u32 %s1627_s6, 4  ;;  %s1312_s5 = int_to_ptr.vmem [resolvable:$true] %s1311_s5 }
 0x485   :  { %v996_v0 = vadd.f32 %v995_v63, %v951_v62 }
 0x487   :  { %v1407_v1 = vmul.f32 -1.442695, %v996_v0 }
 0x489   :  { %1487 = vpow2.f32 %v1407_v1  ;;  %v1486_v2 = vpop.eup %1485 }
 0x48a   :  { %v1022_v6 = vadd.f32 1.0, %v1486_v2 }
 0x48c   :  { %v1034_v18 = vand.u32 2147483648, %v1022_v6  ;;  %vm1028_vm1 = vweird.f32 %v1022_v6  ;;  %v1032_v21 = vand.u32 2147483647, %v1022_v6 }
 0x48e   :  { %v1035_v36 = vor.u32 1.1754944e-38, %v1034_v18  ;;  %vm1033_vm3 = vcmp.eq.f32.partialorder %v1032_v21, 8.507059e+37 }
 0x48f   :  { %v1488_v3 = vpop.eup %1487 }
 0x490   :  { %v1000_v7 = vadd.f32 1.0, %v1488_v3  ;;  %v1166_v3 = vld [vmem:[#allocation5 + $0x30] sm:$0xff] }
 0x492   :  { %1489 = vrcp.f32 %v1000_v7  ;;  %v1012_v10 = vand.u32 2147483648, %v1000_v7  ;;  %v1010_v17 = vand.u32 2147483647, %v1000_v7  ;;  %vm1006_vm12 = vweird.f32 %v1000_v7 }
 0x493   :  { %1491 = vrcp.f32 %v1022_v6 }
 0x494   :  { %v1013_v5 = vor.u32 1.1754944e-38, %v1012_v10  ;;  %vm1011_vm14 = vcmp.eq.f32.partialorder %v1010_v17, 8.507059e+37 }
 0x498   :  { %v1490_v8 = vpop.eup %1489 }
 0x499   :  { %v1492_v24 = vpop.eup %1491  ;;  %v1002_v33 = vmul.f32 %v1490_v8, %v1000_v7  ;;  %vm1007_vm11 = vweird.f32 %v1490_v8 }
 0x49a   :  { %v1024_v9 = vmul.f32 %v1492_v24, %v1022_v6  ;;  %vm1008_vm13 = vmor %vm1006_vm12, %vm1007_vm11  ;;  %vm1029_vm15 = vweird.f32 %v1492_v24 }
 0x49b   :  { %v1003_v26 = vsub.f32 1.0, %v1002_v33  ;;  %vm1030_vm2 = vmor %vm1028_vm1, %vm1029_vm15 }
 0x49c   :  { %v1025_v11 = vsub.f32 1.0, %v1024_v9 }
 0x49d   :  { %v1004_v4 = vmul.f32 %v1490_v8, %v1003_v26 }
 0x49e   :  { %v1026_v16 = vmul.f32 %v1492_v24, %v1025_v11 }
 0x49f   :  { %v1005_v23 = vadd.f32 %v1490_v8, %v1004_v4 }
 0x4a0   :  { %v1027_v15 = vadd.f32 %v1492_v24, %v1026_v16  ;;  %v1271_v16 = vld [vmem:[#allocation4 + $0x38] sm:$0xff] }
 0x4a1   :  { %v1009_v19 = vsel %vm1008_vm13, %v1490_v8, %v1005_v23  ;;  %v1182_v23 = vpop.permute.xlu1 %1181 }
 0x4a2   :  { %v1014_v14 = vsel %vm1011_vm14, %v1013_v5, %v1009_v19  ;;  %v1031_v25 = vsel %vm1030_vm2, %v1492_v24, %v1027_v15 }
 0x4a3   :  { %v1040_v13 = vmul.f32 %v1014_v14, %v992_v12  ;;  %v1036_v39 = vsel %vm1033_vm3, %v1035_v36, %v1031_v25  ;;  %v1249_v12 = vld [vmem:[#allocation3 + $0x38] sm:$0xff] }
 0x4a5   :  { %v1041_v48 = vadd.f32 %v1040_v13, %v1039_v20 }
 0x4a7   :  { %1493 = vtanh.f32 %v1041_v48 }
 0x4ad   :  { %v1494_v27 = vpop.eup %1493 }
 0x4ae   :  { %v1043_v59 = vsub.f32 %v2001_v54, %v1494_v27 }
 0x4b0   :  { %v1044_v28 = vmul.f32 %v1043_v59, %v1036_v39 }
 0x4b2   :  { %v1045_v29 = vadd.f32 %v1494_v27, %v1044_v28 }
 0x4b4   :  { %1047 = vst.msk [vmem:[#allocation11 + $0x28] sm:$0xff] %vm67_vm0, %v1045_v29  ;;  %v1057_v31 = vmul.f32 %v1055_v30, %v1045_v29 }
 0x4b6   :  { %1410 = vmatmul.msk.f32.vlgmr.msrb.gmra.mxu2 %vm67_vm0, %v1057_v31  ;;  %1411 = vmatmul.msk.f32.vlgmr.msra.gmra.mxu3 %vm67_vm0, %v1057_v31 }
 0x4b7   :  { %1412 = vmatmul.msk.f32.vlgmr.msra.gmra.mxu0 %vm67_vm0, %v1057_v31 }
 0x534   :  { %v1118_v56 = vpop.f32.mrf.mxu0 }
 0x535   :  { %v1119_v62 = vadd.f32 %v1517_v61, %v1118_v56 }
 0x539   :  { %v1078_v34 = vpop.f32.mrf.mxu2  ;;  %v1098_v37 = vpop.f32.mrf.mxu3 }
 0x53a   :  { %v1123_v41 = vadd.f32 %v1122_v35, %v1078_v34  ;;  %v1145_v32 = vadd.f32 %v1144_v38, %v1098_v37 }
 0x53c   :  { %v1413_v42 = vmul.f32 -1.442695, %v1123_v41  ;;  %v1414_v43 = vmul.f32 -1.442695, %v1145_v32 }
 0x53e   :  { %1495 = vpow2.f32 %v1413_v42 }
 0x53f   :  { %1497 = vpow2.f32 %v1414_v43 }
 0x544   :  { %v1496_v44 = vpop.eup %1495 }
 0x545   :  { %v1498_v45 = vpop.eup %1497  ;;  %v1127_v46 = vadd.f32 1.0, %v1496_v44 }
 0x546   :  { %v1149_v47 = vadd.f32 1.0, %v1498_v45  ;;  %v1293_v45 = vld [vmem:[#allocation5 + $0x38] sm:$0xff] }
 0x547   :  { %1499 = vrcp.f32 %v1127_v46  ;;  %v1139_v52 = vand.u32 2147483648, %v1127_v46  ;;  %v1137_v55 = vand.u32 2147483647, %v1127_v46  ;;  %vm1133_vm5 = vweird.f32 %v1127_v46 }
 0x548   :  { %1501 = vrcp.f32 %v1149_v47  ;;  %v1161_v8 = vand.u32 2147483648, %v1149_v47  ;;  %vm1155_vm9 = vweird.f32 %v1149_v47  ;;  %v1159_v24 = vand.u32 2147483647, %v1149_v47 }
 0x549   :  { %v1140_v58 = vor.u32 1.1754944e-38, %v1139_v52  ;;  %vm1138_vm7 = vcmp.eq.f32.partialorder %v1137_v55, 8.507059e+37 }
 0x54a   :  { %v1162_v9 = vor.u32 1.1754944e-38, %v1161_v8  ;;  %vm1160_vm11 = vcmp.eq.f32.partialorder %v1159_v24, 8.507059e+37 }
 0x54d   :  { %v1500_v40 = vpop.eup %1499 }
 0x54e   :  { %v1502_v49 = vpop.eup %1501  ;;  %v1129_v50 = vmul.f32 %v1500_v40, %v1127_v46  ;;  %vm1134_vm4 = vweird.f32 %v1500_v40 }
 0x54f   :  { %v1151_v53 = vmul.f32 %v1502_v49, %v1149_v47  ;;  %vm1135_vm6 = vmor %vm1133_vm5, %vm1134_vm4  ;;  %vm1156_vm8 = vweird.f32 %v1502_v49 }
 0x550   :  { %v1130_v51 = vsub.f32 1.0, %v1129_v50  ;;  %vm1157_vm10 = vmor %vm1155_vm9, %vm1156_vm8 }
 0x551   :  { %v1152_v60 = vsub.f32 1.0, %v1151_v53 }
 0x552   :  { %v1131_v54 = vmul.f32 %v1500_v40, %v1130_v51 }
 0x553   :  { %v1153_v2 = vmul.f32 %v1502_v49, %v1152_v60 }
 0x554   :  { %v1132_v57 = vadd.f32 %v1500_v40, %v1131_v54 }
 0x555   :  { %v1154_v7 = vadd.f32 %v1502_v49, %v1153_v2 }
 0x556   :  { %v1136_v63 = vsel %vm1135_vm6, %v1500_v40, %v1132_v57 }
 0x557   :  { %v1141_v0 = vsel %vm1138_vm7, %v1140_v58, %v1136_v63  ;;  %v1158_v33 = vsel %vm1157_vm10, %v1502_v49, %v1154_v7 }
 0x558   :  { %v1167_v1 = vmul.f32 %v1141_v0, %v1119_v62  ;;  %v1163_v4 = vsel %vm1160_vm11, %v1162_v9, %v1158_v33 }
 0x55a   :  { %v1168_v6 = vadd.f32 %v1167_v1, %v1166_v3 }
 0x55c   :  { %1503 = vtanh.f32 %v1168_v6 }
 0x562   :  { %v1504_v26 = vpop.eup %1503 }
 0x563   :  { %v1170_v10 = vsub.f32 %v1057_v31, %v1504_v26 }
 0x565   :  { %v1171_v17 = vmul.f32 %v1170_v10, %v1163_v4 }
 0x567   :  { %v1172_v22 = vadd.f32 %v1504_v26, %v1171_v17 }
 0x569   :  { %1174 = vst.msk [vmem:[#allocation11 + $0x30] sm:$0xff] %vm67_vm0, %v1172_v22  ;;  %v1184_v11 = vmul.f32 %v1182_v23, %v1172_v22 }
 0x56b   :  { %1416 = vmatmul.msk.f32.vlgmr.msra.gmra.mxu1 %vm67_vm0, %v1184_v11  ;;  %1417 = vmatmul.msk.f32.vlgmr.msra.gmra.mxu2 %vm67_vm0, %v1184_v11 }
 0x56c   :  { %1418 = vmatmul.msk.f32.vlgmr.msrb.gmra.mxu3 %vm67_vm0, %v1184_v11 }
 0x5e8   :  { %v1205_v5 = vpop.f32.mrf.mxu1 }
 0x5e9   :  { %v1250_v19 = vadd.f32 %v1249_v12, %v1205_v5 }
 0x5eb   :  { %v1419_v14 = vmul.f32 -1.442695, %v1250_v19 }
 0x5ed   :  { %1505 = vpow2.f32 %v1419_v14 }
 0x5ee   :  { %v1225_v13 = vpop.f32.mrf.mxu2 }
 0x5ef   :  { %v1272_v20 = vadd.f32 %v1271_v16, %v1225_v13  ;;  %v1245_v31 = vpop.f32.mrf.mxu3 }
 0x5f0   :  { %v1246_v41 = vadd.f32 %v1517_v61, %v1245_v31 }
 0x5f1   :  { %v1420_v48 = vmul.f32 -1.442695, %v1272_v20 }
 0x5f3   :  { %v1506_v15 = vpop.eup %1505  ;;  %1507 = vpow2.f32 %v1420_v48 }
 0x5f4   :  { %v1254_v18 = vadd.f32 1.0, %v1506_v15 }
 0x5f6   :  { %1509 = vrcp.f32 %v1254_v18  ;;  %v1266_v39 = vand.u32 2147483648, %v1254_v18  ;;  %v1264_v29 = vand.u32 2147483647, %v1254_v18  ;;  %vm1260_vm13 = vweird.f32 %v1254_v18 }
 0x5f8   :  { %v1267_v37 = vor.u32 1.1754944e-38, %v1266_v39  ;;  %vm1265_vm15 = vcmp.eq.f32.partialorder %v1264_v29, 8.507059e+37 }
 0x5f9   :  { %v1508_v21 = vpop.eup %1507 }
 0x5fa   :  { %v1276_v25 = vadd.f32 1.0, %v1508_v21 }
 0x5fc   :  { %v1510_v27 = vpop.eup %1509  ;;  %1511 = vrcp.f32 %v1276_v25  ;;  %v1288_v40 = vand.u32 2147483648, %v1276_v25  ;;  %vm1282_vm2 = vweird.f32 %v1276_v25  ;;  %v1286_v49 = vand.u32 2147483647, %v1276_v25 }
 0x5fd   :  { %v1256_v36 = vmul.f32 %v1510_v27, %v1254_v18  ;;  %vm1261_vm12 = vweird.f32 %v1510_v27 }
 0x5fe   :  { %vm1262_vm14 = vmor %vm1260_vm13, %vm1261_vm12  ;;  %v1289_v52 = vor.u32 1.1754944e-38, %v1288_v40  ;;  %vm1287_vm4 = vcmp.eq.f32.partialorder %v1286_v49, 8.507059e+37 }
 0x5ff   :  { %v1257_v59 = vsub.f32 1.0, %v1256_v36 }
 0x601   :  { %v1258_v28 = vmul.f32 %v1510_v27, %v1257_v59 }
 0x602   :  { %v1512_v30 = vpop.eup %1511 }
 0x603   :  { %v1278_v34 = vmul.f32 %v1512_v30, %v1276_v25  ;;  %v1259_v35 = vadd.f32 %v1510_v27, %v1258_v28  ;;  %vm1283_vm1 = vweird.f32 %v1512_v30 }
 0x604   :  { %vm1284_vm3 = vmor %vm1282_vm2, %vm1283_vm1 }
 0x605   :  { %v1279_v38 = vsub.f32 1.0, %v1278_v34  ;;  %v1263_v32 = vsel %vm1262_vm14, %v1510_v27, %v1259_v35 }
 0x606   :  { %v1268_v42 = vsel %vm1265_vm15, %v1267_v37, %v1263_v32 }
 0x607   :  { %v1294_v43 = vmul.f32 %v1268_v42, %v1246_v41  ;;  %v1280_v44 = vmul.f32 %v1512_v30, %v1279_v38 }
 0x609   :  { %v1295_v46 = vadd.f32 %v1294_v43, %v1293_v45  ;;  %v1281_v47 = vadd.f32 %v1512_v30, %v1280_v44 }
 0x60b   :  { %1513 = vtanh.f32 %v1295_v46  ;;  %v1285_v50 = vsel %vm1284_vm3, %v1512_v30, %v1281_v47 }
 0x60c   :  { %v1290_v54 = vsel %vm1287_vm4, %v1289_v52, %v1285_v50 }
 0x611   :  { %v1514_v51 = vpop.eup %1513 }
 0x612   :  { %v1297_v53 = vsub.f32 %v1184_v11, %v1514_v51 }
 0x614   :  { %v1298_v55 = vmul.f32 %v1297_v53, %v1290_v54 }
 0x616   :  { %v1299_v56 = vadd.f32 %v1514_v51, %v1298_v55 }
 0x618   :  { %1301 = vst.msk [vmem:[#allocation11 + $0x38] sm:$0xff] %vm67_vm0, %v1299_v56 }
 0x619   :  { %1302 = vst.msk [vmem:[#allocation2] sm:$0xff] %vm67_vm0, %v1299_v56  ;;  %1319 = dma.vmem_to_hbm [thread:$0]  %s1312_s5, 1024, %s1314_s12, [#allocation8], %s1623_s13, %s1623_s13, %s1624_s14  }
 0x61a   :  { %1306 = vst.msk [vmem:[#allocation12] sm:$0xff] %vm67_vm0, %v1299_v56 }
 0x61b   :  { %1330 = dma.vmem_to_hbm [thread:$0]  %s1326_s16, 128, %s1328_s17, [#allocation13]  }
 0x61c   :  { %1618 = dma.done.wait [#allocation8], 1024  }
 0x61d   :  { %1619 = vsyncadd [#allocation8], 4294966272 }
 0x61e   :  { %1620 = dma.done.wait [#allocation13], 128  }
 0x61f   :  { %1621 = vsyncadd [#allocation13], 4294967168 }
 0x620   :  { %1339 = vsyncpa [#allocation7], 1 }
 0x621   :  { %1340 = vsyncpa [#allocation10], 1 }
 0x622   :  { %1341 = vsyncpa [#allocation8], 1 }
 0x623   :  { %1342 = vsyncpa [#allocation13], 1 }

</bundles_post_ra>
